<compile_context>
chip_gen: v7x
topology: tpu7x:2x2x1
jax: 0.10.0
libtpu: 0.0.40
codegen_flags: <defaults>
</compile_context>

<pallas_src>
import jax
import jax.numpy as jnp
from jax import lax
from jax.experimental import pallas as pl
from jax.experimental.pallas import tpu as pltpu


def residual_kernel(x_ref, w_ref, b_ref, g_ref, beta_ref, o_ref):
    # x_ref: (TM, D) bf16/f32   w_ref: (D, D) bf16   b/g/beta: (1, D) f32
    x = x_ref[...]
    x_f32 = x.astype(jnp.float32)

    # sublayer: Linear(D, D) -> y = x @ W^T + b (W^T pre-transposed, resident
    # bf16 in VMEM).  bf16 operands on the MXU, f32 accumulation.
    y = jnp.dot(x.astype(jnp.bfloat16), w_ref[...],
                preferred_element_type=jnp.float32)

    # dropout (eval mode) is identity; residual add in f32.
    z = x_f32 + y + b_ref[...]

    # LayerNorm over last dim, eps=1e-5.  Two-pass centered variance for
    # numerical robustness (matches PyTorch LayerNorm behaviour closely).
    inv = lax.rsqrt
    mean = jnp.mean(z, axis=-1, keepdims=True)
    zc = z - mean
    var = jnp.mean(zc * zc, axis=-1, keepdims=True)
    zn = zc * inv(var + 1e-5)

    o_ref[...] = (zn * g_ref[...] + beta_ref[...]).astype(o_ref.dtype)


def _pick_tile_m(R, D, *, in_bytes, out_bytes, weight_bytes,
                 max_tile=1024, vmem_budget=40 << 20, min_steps=4):
    """Row-tile size: multiple of 8, VMEM-budgeted (incl. body temporaries),
    and guaranteeing >= min_steps grid iterations (>= 2 per TC on v7x) when R
    is large enough, so the pipeline actually overlaps DMA and compute."""
    # Per-row VMEM: double-buffered in/out pipeline tiles + ~5 f32 temporaries
    # (y, z, zc, zn, scaled output) live inside the kernel body.
    per_row = 2 * D * (in_bytes + out_bytes) + 5 * D * 4
    budget = max(vmem_budget - 2 * weight_bytes, per_row * 8)
    cap = max(8, (budget // per_row) // 8 * 8)
    tile = min(max_tile, cap)
    # Guarantee >= min_steps grid steps (pipelining + v7x dual-TC sharding).
    if R > 8 * min_steps:
        tile = min(tile, max(8, (R // min_steps) // 8 * 8))
    tile = min(tile, ((R + 7) // 8) * 8)   # never larger than needed
    return max(8, tile)


def prepare_linear_weight_t(w_t):
    """One-time parameter prep: resident bf16 W^T (y = x @ W^T + b).
    Hoisted out of the per-call path to avoid a per-call f32->bf16 cast and
    the extra HBM round trip of the weight."""
    return w_t.astype(jnp.bfloat16)


def residual_forward(x, w_bf16, b, gamma, beta, *, tile_m=None,
                     out_dtype=None, min_steps=4):
    """x: (B, S, D) bf16 or f32.  w_bf16: (D, D) bf16, already transposed so
    the kernel computes y = x @ w_bf16 + b.  Output dtype defaults to x.dtype."""
    B, S, D = x.shape
    R = B * S
    x2 = x.reshape(R, D)                      # streamed as-is, no dtype cast
    out_dtype = x.dtype if out_dtype is None else out_dtype

    in_bytes = jnp.dtype(x.dtype).itemsize
    out_bytes = jnp.dtype(out_dtype).itemsize
    weight_bytes = D * D * 2                  # bf16 weight

    if tile_m is None:
        tile_m = _pick_tile_m(R, D, in_bytes=in_bytes, out_bytes=out_bytes,
                              weight_bytes=weight_bytes, min_steps=min_steps)

    # Partial last block is handled by Pallas (no wrapper pad / slice needed):
    # LayerNorm is row-independent, so garbage tail rows in the last input
    # block are harmless and are never written back.
    grid = (pl.cdiv(R, tile_m),)

    b2 = b.reshape(1, D).astype(jnp.float32)
    g2 = gamma.reshape(1, D).astype(jnp.float32)
    be2 = beta.reshape(1, D).astype(jnp.float32)

    # VMEM estimate: double-buffered x/out pipeline tiles, (up to 2x) bf16
    # weight, f32 kernel-body temporaries, and the small param vectors.
    vmem_est = (2 * tile_m * D * in_bytes
                + 2 * tile_m * D * out_bytes
                + 2 * weight_bytes
                + 5 * tile_m * D * 4
                + 8 * D * 4)
    vmem_limit = int(vmem_est + (12 << 20))   # headroom, no artificial floor

    out = pl.pallas_call(
        residual_kernel,
        out_shape=jax.ShapeDtypeStruct((R, D), out_dtype),
        grid_spec=pltpu.PrefetchScalarGridSpec(
            num_scalar_prefetch=0,
            grid=grid,
            in_specs=[
                pl.BlockSpec((tile_m, D), lambda i: (i, 0)),   # x rows (streamed)
                pl.BlockSpec((D, D), lambda i: (0, 0)),        # bf16 weight (resident)
                pl.BlockSpec((1, D), lambda i: (0, 0)),        # bias
                pl.BlockSpec((1, D), lambda i: (0, 0)),        # gamma
                pl.BlockSpec((1, D), lambda i: (0, 0)),        # beta
            ],
            out_specs=pl.BlockSpec((tile_m, D), lambda i: (i, 0)),
        ),
        compiler_params=pltpu.CompilerParams(
            dimension_semantics=("parallel",),
            vmem_limit_bytes=vmem_limit,
        ),
    )(x2, w_bf16, b2, g2, be2)

    return out.reshape(B, S, D)


def residual_reference(x, w_t, b, gamma, beta, *, matmul_dtype=jnp.float32):
    """Pure-JAX reference: LayerNorm(x + x @ W^T + b) with f32 statistics."""
    xf = x.astype(jnp.float32)
    y = jnp.einsum("bsd,de->bse", x.astype(matmul_dtype),
                   w_t.astype(matmul_dtype),
                   preferred_element_type=jnp.float32) + b.astype(jnp.float32)
    z = xf + y
    mean = jnp.mean(z, axis=-1, keepdims=True)
    var = jnp.mean((z - mean) ** 2, axis=-1, keepdims=True)
    zn = (z - mean) / jnp.sqrt(var + 1e-5)
    return zn * gamma.astype(jnp.float32) + beta.astype(jnp.float32)


if __name__ == "__main__":
    key = jax.random.PRNGKey(0)
    # D = 320 = 5*64 is the Residual dimension inside DDCT's TransformerEncoder.
    B, S, D = 4, 128, 320

    k_x, k_w, k_b = jax.random.split(key, 3)
    # Activations streamed in bf16 (halves HBM bytes of this mem-bound kernel).
    x = jax.random.normal(k_x, (B, S, D), dtype=jnp.float32).astype(jnp.bfloat16)

    # "Sublayer" Linear(D, D) params (PyTorch weight is (out, in); we store the
    # transpose directly so the kernel does x @ w_t + b).
    bound = 1.0 / (D ** 0.5)
    w_t = jax.random.uniform(k_w, (D, D), jnp.float32, -bound, bound)
    b = jax.random.uniform(k_b, (D,), jnp.float32, -bound, bound)

    # LayerNorm affine params (PyTorch init: ones / zeros).
    gamma = jnp.ones((D,), jnp.float32)
    beta = jnp.zeros((D,), jnp.float32)

    # One-time parameter prep (hoisted out of the per-call path).
    w_bf16 = prepare_linear_weight_t(w_t)

    # --- main case: R = 512 -> tile_m = 128, grid = 4 (>= 2 steps per TC). ---
    out = residual_forward(x, w_bf16, b, gamma, beta)
    out = jax.block_until_ready(out)
    assert out.shape == (B, S, D)
    assert out.dtype == jnp.bfloat16

    ref = residual_reference(x, w_t, b, gamma, beta, matmul_dtype=jnp.bfloat16)
    assert jnp.allclose(out.astype(jnp.float32), ref, atol=4e-2, rtol=4e-2), \
        "mismatch vs bf16-matmul reference"

    # Loose check vs. exact f32 Linear semantics (bf16 rounding tolerance).
    ref_f32 = residual_reference(x, w_t, b, gamma, beta)
    assert jnp.allclose(out.astype(jnp.float32), ref_f32, atol=6e-2, rtol=6e-2), \
        "mismatch vs f32 reference"

    # --- ragged case: R = 3*37 = 111 exercises the partial last block path. ---
    x_r = jax.random.normal(jax.random.PRNGKey(1), (3, 37, D),
                            dtype=jnp.float32).astype(jnp.bfloat16)
    out_r = jax.block_until_ready(
        residual_forward(x_r, w_bf16, b, gamma, beta))
    ref_r = residual_reference(x_r, w_t, b, gamma, beta,
                               matmul_dtype=jnp.bfloat16)
    assert out_r.shape == (3, 37, D)
    assert jnp.allclose(out_r.astype(jnp.float32), ref_r, atol=4e-2, rtol=4e-2), \
        "mismatch on non-divisible row count (partial last block)"

    print("KERNEL_OK")
</pallas_src>

<mosaic_0001>
module attributes {stable_mosaic.version = 11 : i64} {
  func.func @residual_kernel(%arg0: i32, %arg1: memref<128x320xbf16, #tpu.memory_space<vmem>>, %arg2: memref<320x320xbf16, #tpu.memory_space<vmem>>, %arg3: memref<1x320xf32, #tpu.memory_space<vmem>>, %arg4: memref<1x320xf32, #tpu.memory_space<vmem>>, %arg5: memref<1x320xf32, #tpu.memory_space<vmem>>, %arg6: memref<128x320xbf16, #tpu.memory_space<vmem>>) attributes {dimension_semantics = [#tpu.dimension_semantics<parallel>], iteration_bounds = array<i64: 4>, scalar_prefetch = 0 : i64, scratch_operands = 0 : i64, tpu.core_type = #tpu.core_type<tc>, window_params = [{transform_indices = @transform_0, window_bounds = array<i64: 128, 320>}, {pipeline_mode = #tpu.pipeline_mode<synchronous>, transform_indices = @transform_1, window_bounds = array<i64: 320, 320>}, {pipeline_mode = #tpu.pipeline_mode<synchronous>, transform_indices = @transform_2, window_bounds = array<i64: 1, 320>}, {pipeline_mode = #tpu.pipeline_mode<synchronous>, transform_indices = @transform_3, window_bounds = array<i64: 1, 320>}, {pipeline_mode = #tpu.pipeline_mode<synchronous>, transform_indices = @transform_4, window_bounds = array<i64: 1, 320>}, {transform_indices = @transform_5, window_bounds = array<i64: 128, 320>}]} {
    %c0 = arith.constant 0 : index
    %c0_0 = arith.constant 0 : index
    %0 = vector.load %arg1[%c0, %c0_0] : memref<128x320xbf16, #tpu.memory_space<vmem>>, vector<128x320xbf16>
    %1 = arith.extf %0 : vector<128x320xbf16> to vector<128x320xf32>
    %c0_1 = arith.constant 0 : index
    %c0_2 = arith.constant 0 : index
    %2 = vector.load %arg2[%c0_1, %c0_2] : memref<320x320xbf16, #tpu.memory_space<vmem>>, vector<320x320xbf16>
    %cst = arith.constant dense<0.000000e+00> : vector<128x320xf32>
    %3 = tpu.matmul %0, %2, %cst {dimension_numbers = #tpu.dot_dimension_numbers<[1], [0], [0], [1], [0, 0, 1, 1], [], []>} : vector<128x320xbf16>, vector<320x320xbf16>, vector<128x320xf32> -> vector<128x320xf32>
    %4 = arith.addf %1, %3 : vector<128x320xf32>
    %c0_3 = arith.constant 0 : index
    %c0_4 = arith.constant 0 : index
    %5 = vector.load %arg3[%c0_3, %c0_4] : memref<1x320xf32, #tpu.memory_space<vmem>>, vector<1x320xf32>
    %6 = vector.broadcast %5 : vector<1x320xf32> to vector<128x320xf32>
    %7 = arith.addf %4, %6 : vector<128x320xf32>
    %cst_5 = arith.constant dense<0.000000e+00> : vector<128xf32>
    %8 = vector.multi_reduction <add>, %7, %cst_5 [1] : vector<128x320xf32> to vector<128xf32>
    %9 = vector.shape_cast %8 : vector<128xf32> to vector<128x1xf32>
    %cst_6 = arith.constant 3.200000e+02 : f32
    %10 = vector.broadcast %cst_6 : f32 to vector<128x1xf32>
    %11 = arith.divf %9, %10 : vector<128x1xf32>
    %12 = vector.broadcast %11 : vector<128x1xf32> to vector<128x320xf32>
    %13 = arith.subf %7, %12 : vector<128x320xf32>
    %14 = arith.mulf %13, %13 : vector<128x320xf32>
    %cst_7 = arith.constant dense<0.000000e+00> : vector<128xf32>
    %15 = vector.multi_reduction <add>, %14, %cst_7 [1] : vector<128x320xf32> to vector<128xf32>
    %16 = vector.shape_cast %15 : vector<128xf32> to vector<128x1xf32>
    %cst_8 = arith.constant 3.200000e+02 : f32
    %17 = vector.broadcast %cst_8 : f32 to vector<128x1xf32>
    %18 = arith.divf %16, %17 : vector<128x1xf32>
    %cst_9 = arith.constant 9.99999974E-6 : f32
    %19 = vector.broadcast %cst_9 : f32 to vector<128x1xf32>
    %20 = arith.addf %18, %19 : vector<128x1xf32>
    %21 = math.rsqrt %20 : vector<128x1xf32>
    %22 = vector.broadcast %21 : vector<128x1xf32> to vector<128x320xf32>
    %23 = arith.mulf %13, %22 : vector<128x320xf32>
    %c0_10 = arith.constant 0 : index
    %c0_11 = arith.constant 0 : index
    %24 = vector.load %arg4[%c0_10, %c0_11] : memref<1x320xf32, #tpu.memory_space<vmem>>, vector<1x320xf32>
    %25 = vector.broadcast %24 : vector<1x320xf32> to vector<128x320xf32>
    %26 = arith.mulf %23, %25 : vector<128x320xf32>
    %c0_12 = arith.constant 0 : index
    %c0_13 = arith.constant 0 : index
    %27 = vector.load %arg5[%c0_12, %c0_13] : memref<1x320xf32, #tpu.memory_space<vmem>>, vector<1x320xf32>
    %28 = vector.broadcast %27 : vector<1x320xf32> to vector<128x320xf32>
    %29 = arith.addf %26, %28 : vector<128x320xf32>
    %30 = arith.truncf %29 : vector<128x320xf32> to vector<128x320xbf16>
    %c0_14 = arith.constant 0 : index
    %c0_15 = arith.constant 0 : index
    %31 = vector.load %arg6[%c0_14, %c0_15] : memref<128x320xbf16, #tpu.memory_space<vmem>>, vector<128x320xbf16>
    tpu.vector_store %arg6[%c0_14, %c0_15], %30 {strides = array<i32>} : memref<128x320xbf16, #tpu.memory_space<vmem>>, vector<128x320xbf16>,
    return
  }
  func.func @transform_0(%arg0: i32) -> (i32, i32) {
    %c0_i32 = arith.constant 0 : i32
    %c0_i32_0 = arith.constant 0 : i32
    return %arg0, %c0_i32 : i32, i32
  }
  func.func @transform_1(%arg0: i32) -> (i32, i32) {
    %c0_i32 = arith.constant 0 : i32
    %c0_i32_0 = arith.constant 0 : i32
    %c0_i32_1 = arith.constant 0 : i32
    return %c0_i32, %c0_i32_0 : i32, i32
  }
  func.func @transform_2(%arg0: i32) -> (i32, i32) {
    %c0_i32 = arith.constant 0 : i32
    %c0_i32_0 = arith.constant 0 : i32
    %c0_i32_1 = arith.constant 0 : i32
    return %c0_i32, %c0_i32_0 : i32, i32
  }
  func.func @transform_3(%arg0: i32) -> (i32, i32) {
    %c0_i32 = arith.constant 0 : i32
    %c0_i32_0 = arith.constant 0 : i32
    %c0_i32_1 = arith.constant 0 : i32
    return %c0_i32, %c0_i32_0 : i32, i32
  }
  func.func @transform_4(%arg0: i32) -> (i32, i32) {
    %c0_i32 = arith.constant 0 : i32
    %c0_i32_0 = arith.constant 0 : i32
    %c0_i32_1 = arith.constant 0 : i32
    return %c0_i32, %c0_i32_0 : i32, i32
  }
  func.func @transform_5(%arg0: i32) -> (i32, i32) {
    %c0_i32 = arith.constant 0 : i32
    %c0_i32_0 = arith.constant 0 : i32
    return %arg0, %c0_i32 : i32, i32
  }
}

</mosaic_0001>

<bundles_post_ra>
// kernel: tpu_custom_call.1
= control target key start
LH: loop header
LB: loop body
LE: loop exit
PB: predicated region body
PF: predicated region fallthrough
CT: control target
= control target key end

     0   :  { %s2642_s18 = smov 0   ;;  %s4065_s0 = inlined_call_operand.vmem [shape: bf16[512,320], index: 0, kind: input, shape index: {}]   ;;  %s4066_s1 = inlined_call_operand.vmem [shape: bf16[320,320], index: 1, kind: input, shape index: {}]   ;;  %s4067_s2 = inlined_call_operand.vmem [shape: f32[1,320], index: 2, kind: input, shape index: {}]   ;;  %s4068_s3 = inlined_call_operand.vmem [shape: f32[1,320], index: 3, kind: input, shape index: {}]   ;;  %s4069_s4 = inlined_call_operand.vmem [shape: f32[1,320], index: 4, kind: input, shape index: {}]   ;;  %s4070_s5 = inlined_call_operand.vmem [shape: bf16[512,320], index: 5, kind: output, shape index: {}]  }
   0x1 LB: > { %s2142_s19 = sadd.s32 4294967295, %s2609_s18   ;;  %p2146_p0 = scmp.ge.s32.totalorder %s2609_s18, 1  ;;  %s2609_s18 = sphi %s2642_s18, %s15_s18  }
   0x2   : > { %p189_p1 = scmp.lt.s32.totalorder %s2609_s18, 5 }
   0x4   : > { %p190_p2 = pnand %p2146_p0, %p189_p1 }
   0x6   : > { %193 = sbr.rel (%p190_p2) target bundleno = 742 (0x2e6), region = 40 }
   0xd   : > { %v2467_v0 = vld [vmem:[%s4066_s1 + $0x4] ss:$12 sps:$4 sm:$0xff]   ;;  %s2147_s22 = sshll.u32 %s2142_s19, 4  ;;  %v2611_v2 = vmov 0   ;;  %v2471_v3 = vld [vmem:[%s4066_s1] ss:$12 sps:$4 sm:$0xff]  }
   0xe   : > { %v2656_v1 = vld [vmem:[%s4066_s1 + $0x184] ss:$12 sps:$4 sm:$0xff]   ;;  %1034 = vmatprep.mubr.bf16.mxu1 %v2611_v2  ;;  %p220_p3 = scmp.lt.s32.totalorder %s2147_s22, 63  ;;  %859 = vmatprep.subr.bf16.mxu0 %v2467_v0  ;;  %v2665_v4 = vld [vmem:[%s4066_s1 + $0x180] ss:$12 sps:$4 sm:$0xff]   ;;  %vm834_vm0 = vcmask 523264  }
   0xf   : > { %2417 = vmatprep.subr.bf16.mxu1 %v2656_v1  ;;  %v2473_v5 = vld [vmem:[%s4066_s1 + $0x1c] ss:$12 sps:$4 sm:$0xff]   ;;  %860 = vmatpush1.bf16.msra.mxu0 %v2471_v3  ;;  %v2477_v7 = vld [vmem:[%s4066_s1 + $0x18] ss:$12 sps:$4 sm:$0xff]   ;;  %v2479_v9 = vld [vmem:[%s4066_s1 + $0x34] ss:$12 sps:$4 sm:$0xff]  }
  0x10   : > { %s4238_s22 = smov (!%p220_p3, %s2147_s22), 63  ;;  %2421 = vmatpush1.bf16.msra.mxu1 %v2665_v4  ;;  %v2677_v6 = vld [vmem:[%s4066_s1 + $0x19c] ss:$12 sps:$4 sm:$0xff]   ;;  %861 = vmatprep.subr.bf16.mxu0 %v2473_v5  ;;  %v2685_v8 = vld [vmem:[%s4066_s1 + $0x198] ss:$12 sps:$4 sm:$0xff]   ;;  %vm2052_vm1 = vcmask 519168  }
  0x11   : > { %s2457_s12 = smul.u32 12, %s4238_s22  ;;  %2418 = vmatprep.subr.bf16.mxu1 %v2677_v6  ;;  %v2695_v10 = vld [vmem:[%s4066_s1 + $0x1b4] ss:$12 sps:$4 sm:$0xff]   ;;  %v2483_v11 = vld [vmem:[%s4066_s1 + $0x30] ss:$12 sps:$4 sm:$0xff]  }
  0x12   : > { %v2703_v12 = vld [vmem:[%s4066_s1 + $0x1b0] ss:$12 sps:$4 sm:$0xff]   ;;  %v2485_v13 = vld [vmem:[%s4066_s1 + $0x4c] ss:$12 sps:$4 sm:$0xff]   ;;  %v2489_v15 = vld [vmem:[%s4066_s1 + $0x48] ss:$12 sps:$4 sm:$0xff]  }
  0x13   : > { %862 = vmatpush1.bf16.msra.mxu0 %v2477_v7  ;;  %v2713_v14 = vld [vmem:[%s4066_s1 + $0x1cc] ss:$12 sps:$4 sm:$0xff]   ;;  %s2720_s29 = scalar_lea.vmem %s4065_s0, %s2457_s12  ;;  %v2728_v16 = vld [vmem:[%s4066_s1 + $0x1c8] ss:$12 sps:$4 sm:$0xff]   ;;  %v2491_v19 = vld [vmem:[%s4066_s1 + $0x64] ss:$12 sps:$4 sm:$0xff]   ;;  %s3878_s23 = scalar_lea.vmem %s4070_s5, %s2457_s12 }
  0x14   : > { %2422 = vmatpush1.bf16.msra.mxu1 %v2685_v8  ;;  %863 = vmatprep.subr.bf16.mxu0 %v2479_v9  ;;  %v2732_v17 = vld [vmem:[%s2720_s29 + $0x50] sm:$0xf]  ;;  %v2735_v18 = vld [vmem:[%s2720_s29 + $0x5c] sm:$0xf]  ;;  %v2497_v20 = vld [vmem:[%s4066_s1 + $0xc8] ss:$12 sps:$4 sm:$0xff]  }
  0x15   : > { %2419 = vmatprep.subr.bf16.mxu1 %v2695_v10  ;;  %v2746_v21 = vcombine.low %v2732_v17, %v2735_v18  ;;  %v2494_v22 = vld [vmem:[%s4066_s1 + $0x60] ss:$12 sps:$4 sm:$0xff]   ;;  %v2499_v23 = vld [vmem:[%s4066_s1 + $0x8] ss:$12 sps:$4 sm:$0xff]   ;;  %v2498_v25 = vld [vmem:[%s4066_s1 + $0x78] ss:$12 sps:$4 sm:$0xff]  }
  0x16   : > { %v2495_v24 = vld [vmem:[%s4066_s1 + $0x7c] ss:$12 sps:$4 sm:$0xff]   ;;  %v2504_v27 = vld [vmem:[%s4066_s1 + $0xe0] ss:$12 sps:$4 sm:$0xff]   ;;  %v2770_v28 = vld [vmem:[%s2720_s29 + $0x74] sm:$0xf] }
  0x17   : > { %864 = vmatpush1.bf16.msra.mxu0 %v2483_v11  ;;  %v2762_v26 = vld [vmem:[%s2720_s29 + $0x68] sm:$0xf]  ;;  %v2505_v29 = vld [vmem:[%s4066_s1 + $0x20] ss:$12 sps:$4 sm:$0xff]   ;;  %v2509_v31 = vld [vmem:[%s4066_s1 + $0xf8] ss:$12 sps:$4 sm:$0xff]  }
  0x18   : > { %2423 = vmatpush1.bf16.msra.mxu1 %v2703_v12  ;;  %865 = vmatprep.subr.bf16.mxu0 %v2485_v13  ;;  %v2500_v30 = vld [vmem:[%s4066_s1 + $0x94] ss:$12 sps:$4 sm:$0xff]   ;;  %v2784_v32 = vcombine.low %v2762_v26, %v2770_v28  ;;  %v2503_v33 = vld [vmem:[%s4066_s1 + $0x90] ss:$12 sps:$4 sm:$0xff]   ;;  %v2506_v34 = vld [vmem:[%s4066_s1 + $0xac] ss:$12 sps:$4 sm:$0xff]  }
  0x19   : > { %2420 = vmatprep.subr.bf16.mxu1 %v2713_v14  ;;  %v2510_v35 = vld [vmem:[%s4066_s1 + $0x38] ss:$12 sps:$4 sm:$0xff]   ;;  %v2515_v36 = vld [vmem:[%s4066_s1 + $0x110] ss:$12 sps:$4 sm:$0xff]   ;;  %v2508_v37 = vld [vmem:[%s4066_s1 + $0xa8] ss:$12 sps:$4 sm:$0xff]  }
  0x1a   : > { %v2805_v38 = vld [vmem:[%s2720_s29 + $0x80] sm:$0xf]  ;;  %v2808_v39 = vld [vmem:[%s2720_s29 + $0x8c] sm:$0xf]  ;;  %v2511_v40 = vld [vmem:[%s4066_s1 + $0xc4] ss:$12 sps:$4 sm:$0xff]  }
  0x1b   : > { %866 = vmatpush1.bf16.msra.mxu0 %v2489_v15  ;;  %v2518_v41 = vld [vmem:[%s4066_s1 + $0x50] ss:$12 sps:$4 sm:$0xff]   ;;  %v2818_v42 = vcombine.low %v2805_v38, %v2808_v39  ;;  %v2514_v43 = vld [vmem:[%s4066_s1 + $0xc0] ss:$12 sps:$4 sm:$0xff]   ;;  %v2523_v44 = vld [vmem:[%s4066_s1 + $0x128] ss:$12 sps:$4 sm:$0xff]  }
  0x1c   : > { %2424 = vmatpush1.bf16.msra.mxu1 %v2728_v16  ;;  %867 = vmatprep.subr.bf16.mxu0 %v2491_v19  ;;  %v2516_v45 = vld [vmem:[%s4066_s1 + $0xdc] ss:$12 sps:$4 sm:$0xff]   ;;  %v2519_v47 = vld [vmem:[%s4066_s1 + $0xd8] ss:$12 sps:$4 sm:$0xff]   ;;  %v2528_v48 = vld [vmem:[%s4066_s1 + $0x140] ss:$12 sps:$4 sm:$0xff]  }
  0x1d   : > { %2317 = vmatprep.subr.bf16.mxu1 %v2497_v20  ;;  %v2525_v46 = vld [vmem:[%s4066_s1 + $0x68] ss:$12 sps:$4 sm:$0xff]   ;;  %v2841_v49 = vld [vmem:[%s2720_s29 + $0x98] sm:$0xf]  ;;  %v2845_v50 = vld [vmem:[%s2720_s29 + $0xa4] sm:$0xf] }
  0x1e   : > { %4106 = vst [vmem:[#allocation2_spill] sm:$0xff] %v2841_v49  ;;  %4107 = vst [vmem:[#allocation3_spill] sm:$0xff] %v2845_v50  ;;  %v2520_v51 = vld [vmem:[%s4066_s1 + $0xf4] ss:$12 sps:$4 sm:$0xff]   ;;  %v2534_v53 = vld [vmem:[%s4066_s1 + $0x158] ss:$12 sps:$4 sm:$0xff]   ;;  %v2858_v54 = vcombine.low %v2841_v49, %v2845_v50 }
  0x1f   : > { %2238 = vmatmul.mubr.msk.bf16.vlgmr.msra.gmra.mrb[0].mxu1 %vm834_vm0, %v2746_v21  ;;  %868 = vmatpush1.bf16.msra.mxu0 %v2494_v22  ;;  %v2530_v52 = vld [vmem:[%s4066_s1 + $0x80] ss:$12 sps:$4 sm:$0xff]   ;;  %v2524_v55 = vld [vmem:[%s4066_s1 + $0xf0] ss:$12 sps:$4 sm:$0xff]   ;;  %v2536_v57 = vld [vmem:[%s4066_s1 + $0x98] ss:$12 sps:$4 sm:$0xff]  }
  0x20   : > { %2318 = vmatpush3.bf16.msra.mxu1 %v2499_v23  ;;  %869 = vmatprep.subr.bf16.mxu0 %v2495_v24  ;;  %v2526_v56 = vld [vmem:[%s4066_s1 + $0x10c] ss:$12 sps:$4 sm:$0xff]   ;;  %v2529_v58 = vld [vmem:[%s4066_s1 + $0x108] ss:$12 sps:$4 sm:$0xff]   ;;  %v2539_v59 = vld [vmem:[%s4066_s1 + $0x170] ss:$12 sps:$4 sm:$0xff]  }
  0x21   : > { %1044 = vmatprep.mubr.bf16.mxu1 %v2611_v2  ;;  %2319 = vmatprep.subr.bf16.mxu1 %v2504_v27  ;;  %v2531_v60 = vld [vmem:[%s4066_s1 + $0x124] ss:$12 sps:$4 sm:$0xff]   ;;  %v2891_v0 = vld [vmem:[%s2720_s29 + $0xbc] sm:$0xf]  ;;  %v2549_v9 = vld [vmem:[%s4066_s1 + $0x188] ss:$12 sps:$4 sm:$0xff]  }
  0x22   : > { %v2881_v61 = vld [vmem:[%s2720_s29 + $0xb0] sm:$0xf]  ;;  %v2884_v62 = vld [vmem:[%s2720_s29] sm:$0xff]  ;;  %4109 = vst [vmem:[#allocation5_spill] sm:$0xff] %v2891_v0  ;;  %v2537_v13 = vld [vmem:[%s4066_s1 + $0x13c] ss:$12 sps:$4 sm:$0xff]  }
  0x23   : > { %870 = vmatpush1.bf16.msra.mxu0 %v2498_v25  ;;  %4108 = vst [vmem:[#allocation4_spill] sm:$0xff] %v2881_v61  ;;  %v2887_v63 = vld [vmem:[%s2720_s29 + $0xc] sm:$0xff]  ;;  %v2900_v7 = vcombine.low %v2881_v61, %v2891_v0  ;;  %v2540_v15 = vld [vmem:[%s4066_s1 + $0x138] ss:$12 sps:$4 sm:$0xff]   ;;  %v2543_v19 = vld [vmem:[%s4066_s1 + $0x154] ss:$12 sps:$4 sm:$0xff]  }
  0x24   : > { %2320 = vmatpush3.bf16.msra.mxu1 %v2505_v29  ;;  %871 = vmatprep.subr.bf16.mxu0 %v2500_v30  ;;  %v2152_v3 = vcombine.high %v2884_v62, %v2887_v63  ;;  %v2541_v5 = vld [vmem:[%s4066_s1 + $0xb0] ss:$12 sps:$4 sm:$0xff]   ;;  %v2535_v11 = vld [vmem:[%s4066_s1 + $0x120] ss:$12 sps:$4 sm:$0xff]   ;;  %v2923_v22 = vld [vmem:[%s2720_s29 + $0x24] sm:$0xff]  ;;  %v2151_v23 = vcombine.low %v2884_v62, %v2887_v63 }
  0x25   : > { %2321 = vmatprep.subr.bf16.mxu1 %v2509_v31  ;;  %v2920_v20 = vld [vmem:[%s2720_s29 + $0x18] sm:$0xff]  ;;  %v2555_v29 = vld [vmem:[%s4066_s1 + $0x1a0] ss:$12 sps:$4 sm:$0xff]   ;;  %v2550_v30 = vld [vmem:[%s4066_s1 + $0x168] ss:$12 sps:$4 sm:$0xff]  }
  0x26   : > { %891 = vmatprep.mubr.bf16.mxu0 %v2152_v3  ;;  %v2546_v24 = vld [vmem:[%s4066_s1 + $0x150] ss:$12 sps:$4 sm:$0xff]   ;;  %v2547_v25 = vld [vmem:[%s4066_s1 + $0x16c] ss:$12 sps:$4 sm:$0xff]   ;;  %v2155_v27 = vcombine.high %v2920_v20, %v2923_v22 }
  0x27   : > { %2239 = vmatmul.mubr.msk.bf16.gmra.mrb[4].mxu1 %vm834_vm0, %v2784_v32  ;;  %872 = vmatpush1.bf16.msra.mxu0 %v2503_v33  ;;  %v2560_v31 = vld [vmem:[%s4066_s1 + $0x1b8] ss:$12 sps:$4 sm:$0xff]   ;;  %v2945_v33 = vld [vmem:[%s2720_s29 + $0x30] sm:$0xff] }
  0x28   : > { %1054 = vmatprep.mubr.bf16.mxu1 %v2611_v2  ;;  %873 = vmatprep.subr.bf16.mxu0 %v2506_v34  ;;  %v2948_v34 = vld [vmem:[%s2720_s29 + $0x3c] sm:$0xff] }
  0x29   : > { %2322 = vmatpush3.bf16.msra.mxu1 %v2510_v35  ;;  %4110 = vst [vmem:[#allocation6_spill] sm:$0xff] %v2948_v34  ;;  %v2154_v35 = vcombine.low %v2920_v20, %v2923_v22 }
  0x2a   : > { %2323 = vmatprep.subr.bf16.mxu1 %v2515_v36  ;;  %v2158_v36 = vcombine.high %v2945_v33, %v2948_v34 }
  0x2b   : > { %874 = vmatpush1.bf16.msra.mxu0 %v2508_v37  ;;  %v2565_v37 = vld [vmem:[%s4066_s1 + $0x1d0] ss:$12 sps:$4 sm:$0xff]  }
  0x2c   : > { %875 = vmatprep.subr.bf16.mxu0 %v2511_v40  ;;  %v2960_v40 = vld [vmem:[%s2720_s29 + $0x48] sm:$0xff] }
  0x2d   : > { %2324 = vmatpush3.bf16.msra.mxu1 %v2518_v41  ;;  %v2963_v41 = vld [vmem:[%s2720_s29 + $0x54] sm:$0xff] }
  0x2e   : > { %2325 = vmatprep.subr.bf16.mxu1 %v2523_v44  ;;  %v2986_v44 = vld [vmem:[%s2720_s29 + $0x78] sm:$0xff] }
  0x2f   : > { %2240 = vmatmul.mubr.msk.bf16.gmra.mrb[8].mxu1 %vm834_vm0, %v2818_v42  ;;  %876 = vmatpush1.bf16.msra.mxu0 %v2514_v43  ;;  %v2161_v43 = vcombine.high %v2960_v40, %v2963_v41 }
  0x30   : > { %1064 = vmatprep.mubr.bf16.mxu1 %v2611_v2  ;;  %877 = vmatprep.subr.bf16.mxu0 %v2516_v45 }
  0x31   : > { %2326 = vmatpush3.bf16.msra.mxu1 %v2525_v46  ;;  %v2999_v46 = vld [vmem:[%s2720_s29 + $0x9c] sm:$0xff] }
  0x32   : > { %2327 = vmatprep.subr.bf16.mxu1 %v2528_v48 }
  0x33   : > { %878 = vmatpush1.bf16.msra.mxu0 %v2519_v47 }
  0x34   : > { %879 = vmatprep.subr.bf16.mxu0 %v2520_v51  ;;  %v3006_v51 = vld [vmem:[%s2720_s29 + $0xa8] sm:$0xff] }
  0x35   : > { %2328 = vmatpush3.bf16.msra.mxu1 %v2530_v52  ;;  %4111 = vst [vmem:[#allocation7_spill] sm:$0xff] %v3006_v51  ;;  %v3009_v52 = vld [vmem:[%s2720_s29 + $0xb4] sm:$0xff] }
  0x36   : > { %2329 = vmatprep.subr.bf16.mxu1 %v2534_v53  ;;  %4112 = vst [vmem:[#allocation8_spill] sm:$0xff] %v3009_v52 }
  0x37   : > { %2241 = vmatmul.mubr.msk.bf16.gmra.mrb[12].mxu1 %vm834_vm0, %v2858_v54  ;;  %880 = vmatpush1.bf16.msra.mxu0 %v2524_v55  ;;  %v2173_v55 = vcombine.high %v3006_v51, %v3009_v52 }
  0x38   : > { %1074 = vmatprep.mubr.bf16.mxu1 %v2611_v2  ;;  %881 = vmatprep.subr.bf16.mxu0 %v2526_v56  ;;  %v3016_v56 = vld [vmem:[%s2720_s29 + $0x8] sm:$0xf] }
  0x39   : > { %2330 = vmatpush3.bf16.msra.mxu1 %v2536_v57  ;;  %v3019_v57 = vld [vmem:[%s2720_s29 + $0x14] sm:$0xf] }
  0x3a   : > { %2331 = vmatprep.subr.bf16.mxu1 %v2539_v59  ;;  %v2153_v59 = vcombine.low %v3016_v56, %v3019_v57 }
  0x3b   : > { %882 = vmatpush1.bf16.msra.mxu0 %v2529_v58  ;;  %v2172_v58 = vcombine.low %v3006_v51, %v3009_v52 }
  0x3c   : > { %883 = vmatprep.subr.bf16.mxu0 %v2531_v60  ;;  %v3027_v60 = vld [vmem:[%s2720_s29 + $0x20] sm:$0xf] }
  0x3d   : > { %2332 = vmatpush3.bf16.msra.mxu1 %v2541_v5  ;;  %v3033_v5 = vld [vmem:[%s2720_s29 + $0x38] sm:$0xf] }
  0x3e   : > { %2393 = vmatprep.subr.bf16.mxu1 %v2549_v9 }
  0x3f   : > { %2242 = vmatmul.mubr.msk.bf16.gmra.mrb[16].mxu1 %vm834_vm0, %v2900_v7  ;;  %884 = vmatpush1.bf16.msra.mxu0 %v2535_v11 }
  0x40   : > { %1117 = vmatprep.mubr.bf16.mxu1 %v2152_v3  ;;  %885 = vmatprep.subr.bf16.mxu0 %v2537_v13  ;;  %v3030_v3 = vld [vmem:[%s2720_s29 + $0x2c] sm:$0xf] }
  0x41   : > { %v2156_v11 = vcombine.low %v3027_v60, %v3030_v3 }
  0x43   : > { %886 = vmatpush1.bf16.msra.mxu0 %v2540_v15 }
  0x44   : > { %887 = vmatprep.subr.bf16.mxu0 %v2543_v19 }
  0x47   : > { %1118 = vmatmul.mubr.bf16.vlgmr.msra.gmra.mrb[20].mxu1 %v2151_v23  ;;  %888 = vmatpush1.bf16.msra.mxu0 %v2546_v24 }
  0x48   : > { %2394 = vmatpush3.bf16.msra.mxu1 %v2549_v9  ;;  %889 = vmatprep.subr.bf16.mxu0 %v2547_v25  ;;  %v3036_v9 = vld [vmem:[%s2720_s29 + $0x44] sm:$0xf] }
  0x49   : > { %1125 = vmatprep.mubr.bf16.mxu1 %v2155_v27  ;;  %2395 = vmatprep.subr.bf16.mxu1 %v2555_v29  ;;  %v2159_v13 = vcombine.low %v3033_v5, %v3036_v9 }
  0x4b   : > { %890 = vmatpush1.bf16.msra.mxu0 %v2550_v30 }
  0x4c   : > { %2396 = vmatpush3.bf16.msra.mxu1 %v2555_v29  ;;  %972 = vmatprep.subr.bf16.mxu0 %v2656_v1  ;;  %v2157_v1 = vcombine.low %v2945_v33, %v2948_v34 }
  0x4d   : > { %2397 = vmatprep.subr.bf16.mxu1 %v2560_v31 }
  0x4e   : > { %892 = vmatmul.mubr.bf16.vlgmr.msra.gmra.mrb[0].mxu0 %v2151_v23 }
  0x4f   : > { %1126 = vmatmul.mubr.bf16.gmra.mrb[24].mxu1 %v2154_v35  ;;  %973 = vmatpush1.bf16.msra.mxu0 %v2665_v4  ;;  %v2973_v4 = vld [vmem:[%s2720_s29 + $0x60] sm:$0xff] }
  0x50   : > { %901 = vmatprep.mubr.bf16.mxu0 %v2155_v27  ;;  %1133 = vmatprep.mubr.bf16.mxu1 %v2158_v36 }
  0x51   : > { %974 = vmatprep.subr.bf16.mxu0 %v2677_v6  ;;  %2398 = vmatpush3.bf16.msra.mxu1 %v2560_v31  ;;  %v2976_v6 = vld [vmem:[%s2720_s29 + $0x6c] sm:$0xff] }
  0x52   : > { %2399 = vmatprep.subr.bf16.mxu1 %v2565_v37 }
  0x53   : > { %975 = vmatpush1.bf16.msra.mxu0 %v2685_v8  ;;  %v2160_v8 = vcombine.low %v2960_v40, %v2963_v41 }
  0x54   : > { %976 = vmatprep.subr.bf16.mxu0 %v2695_v10  ;;  %v2164_v10 = vcombine.high %v2973_v4, %v2976_v6 }
  0x55   : > { %2400 = vmatpush3.bf16.msra.mxu1 %v2565_v37 }
  0x56   : > { %902 = vmatmul.mubr.bf16.gmra.mrb[4].mxu0 %v2154_v35 }
  0x57   : > { %1134 = vmatmul.mubr.bf16.gmra.mrb[28].mxu1 %v2157_v1  ;;  %911 = vmatprep.mubr.bf16.mxu0 %v2158_v36 }
  0x58   : > { %1141 = vmatprep.mubr.bf16.mxu1 %v2161_v43  ;;  %977 = vmatpush1.bf16.msra.mxu0 %v2703_v12  ;;  %v2989_v12 = vld [vmem:[%s2720_s29 + $0x84] sm:$0xff] }
  0x59   : > { %978 = vmatprep.subr.bf16.mxu0 %v2713_v14  ;;  %v2163_v14 = vcombine.low %v2973_v4, %v2976_v6  ;;  %v2167_v45 = vcombine.high %v2986_v44, %v2989_v12  ;;  %v2166_v47 = vcombine.low %v2986_v44, %v2989_v12 }
  0x5c   : > { %979 = vmatpush1.bf16.msra.mxu0 %v2728_v16  ;;  %v2996_v16 = vld [vmem:[%s2720_s29 + $0x90] sm:$0xff] }
  0x5d   : > { %v2170_v48 = vcombine.high %v2996_v16, %v2999_v46  ;;  %v2169_v53 = vcombine.low %v2996_v16, %v2999_v46 }
  0x5e   : > { %912 = vmatmul.mubr.bf16.gmra.mrb[8].mxu0 %v2157_v1 }
  0x5f   : > { %1142 = vmatmul.mubr.bf16.gmra.mrb[32].mxu1 %v2160_v8  ;;  %921 = vmatprep.mubr.bf16.mxu0 %v2161_v43 }
  0x60   : > { %1149 = vmatprep.mubr.bf16.mxu1 %v2164_v10 }
  0x66   : > { %922 = vmatmul.mubr.bf16.gmra.mrb[12].mxu0 %v2160_v8 }
  0x67   : > { %1150 = vmatmul.mubr.bf16.gmra.mrb[36].mxu1 %v2163_v14  ;;  %931 = vmatprep.mubr.bf16.mxu0 %v2164_v10 }
  0x68   : > { %1157 = vmatprep.mubr.bf16.mxu1 %v2167_v45 }
  0x6e   : > { %932 = vmatmul.mubr.bf16.gmra.mrb[16].mxu0 %v2163_v14 }
  0x6f   : > { %1158 = vmatmul.mubr.bf16.gmra.mrb[40].mxu1 %v2166_v47  ;;  %941 = vmatprep.mubr.bf16.mxu0 %v2167_v45 }
  0x70   : > { %1165 = vmatprep.mubr.bf16.mxu1 %v2170_v48 }
  0x76   : > { %942 = vmatmul.mubr.bf16.gmra.mrb[20].mxu0 %v2166_v47 }
  0x77   : > { %1166 = vmatmul.mubr.bf16.gmra.mrb[44].mxu1 %v2169_v53  ;;  %951 = vmatprep.mubr.bf16.mxu0 %v2170_v48 }
  0x78   : > { %1173 = vmatprep.mubr.bf16.mxu1 %v2173_v55 }
  0x7e   : > { %952 = vmatmul.mubr.bf16.gmra.mrb[24].mxu0 %v2169_v53 }
  0x7f   : > { %1174 = vmatmul.mubr.bf16.gmra.mrb[48].mxu1 %v2172_v58  ;;  %961 = vmatprep.mubr.bf16.mxu0 %v2173_v55 }
  0x80   : > { %2401 = vmatprep.mubr.msk.bf16.mxu1 %vm834_vm0, %v2153_v59 }
  0x86   : > { %962 = vmatmul.mubr.bf16.gmra.mrb[28].mxu0 %v2172_v58 }
  0x87   : > { %2402 = vmatmul.mubr.msk.bf16.vlgmr.msra.gmra.mrb[52].mxu1 %vm834_vm0, %v2156_v11  ;;  %1004 = vmatprep.mubr.bf16.mxu0 %v2611_v2 }
  0x88   : > { %2405 = vmatprep.mubr.msk.bf16.mxu1 %vm834_vm0, %v2159_v13 }
  0x8e   : > { %2235 = vmatmul.mubr.msk.bf16.vlgmr.msra.gmra.mrb[0].mxu0 %vm834_vm0, %v2153_v59 }
  0x8f   : > { %2406 = vmatmul.mubr.msk.bf16.gmra.mrb[56].mxu1 %vm834_vm0, %v2746_v21  ;;  %1014 = vmatprep.mubr.bf16.mxu0 %v2611_v2 }
  0x90   : > { %2409 = vmatprep.mubr.msk.bf16.mxu1 %vm834_vm0, %v2784_v32 }
  0x96   : > { %2236 = vmatmul.mubr.msk.bf16.gmra.mrb[4].mxu0 %vm834_vm0, %v2156_v11 }
  0x97   : > { %2410 = vmatmul.mubr.msk.bf16.gmra.mrb[60].mxu1 %vm834_vm0, %v2818_v42  ;;  %1024 = vmatprep.mubr.bf16.mxu0 %v2611_v2 }
  0x98   : > { %2413 = vmatprep.mubr.msk.bf16.mxu1 %vm834_vm0, %v2858_v54 }
  0x9e   : > { %2237 = vmatmul.mubr.msk.bf16.gmra.mrb[8].mxu0 %vm834_vm0, %v2159_v13 }
  0x9f   : > { %2414 = vmatmul.mubr.msk.bf16.gmra.mrb[64].mxu1 %vm834_vm0, %v2900_v7 }
  0xf2   : > { %v1036_v21 = vpop.f32.mrb[0].mxu1 }
  0xf3   : > { %v1038_v15 = vpop.f32.mrb[1].mxu1 }
  0xf4   : > { %v1040_v19 = vpop.f32.mrb[2].mxu1 }
  0xf5   : > { %v1042_v23 = vpop.f32.mrb[3].mxu1 }
  0xfa   : > { %v1046_v32 = vpop.f32.mrb[4].mxu1 }
  0xfb   : > { %v1048_v24 = vpop.f32.mrb[5].mxu1 }
  0xfc   : > { %v3060_v25 = vpop.f32.mrb[6].mxu1 }
  0xfd   : > { %v3062_v27 = vpop.f32.mrb[7].mxu1 }
 0x102   : > { %v3064_v42 = vpop.f32.mrb[8].mxu1 }
 0x103   : > { %v3066_v2 = vpop.f32.mrb[9].mxu1 }
 0x104   : > { %v3068_v54 = vpop.f32.mrb[10].mxu1 }
 0x105   : > { %v3070_v29 = vpop.f32.mrb[11].mxu1 }
 0x10a   : > { %v3072_v30 = vpop.f32.mrb[12].mxu1 }
 0x10b   : > { %v3074_v7 = vpop.f32.mrb[13].mxu1 }
 0x10c   : > { %v3076_v31 = vpop.f32.mrb[14].mxu1 }
 0x10d   : > { %v3078_v35 = vpop.f32.mrb[15].mxu1 }
 0x112   : > { %v3080_v36 = vpop.f32.mrb[16].mxu1 }
 0x113   : > { %v3082_v37 = vpop.f32.mrb[17].mxu1 }
 0x114   : > { %v3084_v1 = vpop.f32.mrb[18].mxu1 }
 0x115   : > { %4113 = vst [vmem:[#allocation9_spill] sm:$0xff] %v3084_v1  ;;  %v3086_v43 = vpop.f32.mrb[19].mxu1 }
 0x116   : > { %4114 = vst [vmem:[#allocation10_spill] sm:$0xff] %v3086_v43 }
 0x11a   : > { %v2333_v8 = vpop.f32.mrb[20].mxu1 }
 0x11b   : > { %v2334_v10 = vpop.f32.mrb[21].mxu1 }
 0x11c   : > { %v3088_v14 = vadd.f32 %v2334_v10, %v2333_v8  ;;  %v2336_v45 = vpop.f32.mrb[22].mxu1 }
 0x11d   : > { %v2337_v47 = vpop.f32.mrb[23].mxu1 }
 0x11e   : > { %4115 = vst [vmem:[#allocation11_spill] sm:$0xff] %v3088_v14  ;;  %v3090_v48 = vadd.f32 %v2337_v47, %v2336_v45 }
 0x120   : > { %4116 = vst [vmem:[#allocation12_spill] sm:$0xff] %v3090_v48 }
 0x122   : > { %v2339_v53 = vpop.f32.mrb[24].mxu1 }
 0x123   : > { %v2340_v55 = vpop.f32.mrb[25].mxu1 }
 0x124   : > { %v3092_v58 = vadd.f32 %v2340_v55, %v2339_v53  ;;  %v2342_v59 = vpop.f32.mrb[26].mxu1 }
 0x125   : > { %v2343_v11 = vpop.f32.mrb[27].mxu1 }
 0x126   : > { %v3094_v13 = vadd.f32 %v2343_v11, %v2342_v59 }
 0x128   : > { %4117 = vst [vmem:[#allocation13_spill] sm:$0xff] %v3094_v13 }
 0x12a   : > { %v2345_v0 = vpop.f32.mrb[28].mxu1 }
 0x12b   : > { %v2346_v50 = vpop.f32.mrb[29].mxu1 }
 0x12c   : > { %v3096_v49 = vadd.f32 %v2346_v50, %v2345_v0  ;;  %v2348_v34 = vpop.f32.mrb[30].mxu1 }
 0x12d   : > { %v2349_v61 = vpop.f32.mrb[31].mxu1 }
 0x12e   : > { %4118 = vst [vmem:[#allocation14_spill] sm:$0xff] %v3096_v49  ;;  %v3098_v8 = vadd.f32 %v2349_v61, %v2348_v34 }
 0x130   : > { %4119 = vst [vmem:[#allocation15_spill] sm:$0xff] %v3098_v8 }
 0x132   : > { %v2351_v10 = vpop.f32.mrb[32].mxu1 }
 0x133   : > { %v2352_v43 = vpop.f32.mrb[33].mxu1 }
 0x134   : > { %v3100_v45 = vadd.f32 %v2352_v43, %v2351_v10  ;;  %v2354_v47 = vpop.f32.mrb[34].mxu1 }
 0x135   : > { %v2355_v48 = vpop.f32.mrb[35].mxu1 }
 0x136   : > { %4120 = vst [vmem:[#allocation16_spill] sm:$0xff] %v3100_v45  ;;  %v3102_v53 = vadd.f32 %v2355_v48, %v2354_v47  ;;  %v1329_v47 = vlaneseq }
 0x138   : > { %4121 = vst [vmem:[#allocation17_spill] sm:$0xff] %v3102_v53 }
 0x139   : > { %v923_v55 = vpop.f32.mrb[12].mxu0 }
 0x13a   : > { %v2357_v1 = vpop.f32.mrb[36].mxu1  ;;  %v3104_v59 = vadd.f32 %v1036_v21, %v923_v55  ;;  %v925_v11 = vpop.f32.mrb[13].mxu0 }
 0x13b   : > { %v2358_v13 = vpop.f32.mrb[37].mxu1  ;;  %v3106_v50 = vadd.f32 %v1038_v15, %v925_v11  ;;  %v927_v0 = vpop.f32.mrb[14].mxu0  ;;  %v1330_v11 = vshrl.u32 %v1329_v47, 7 }
 0x13c   : > { %v3108_v49 = vadd.f32 %v2358_v13, %v2357_v1  ;;  %v2360_v61 = vpop.f32.mrb[38].mxu1  ;;  %v3110_v34 = vadd.f32 %v1040_v19, %v927_v0  ;;  %v929_v43 = vpop.f32.mrb[15].mxu0 }
 0x13d   : > { %v2361_v10 = vpop.f32.mrb[39].mxu1  ;;  %v3112_v8 = vadd.f32 %v1042_v23, %v929_v43 }
 0x13e   : > { %4122 = vst [vmem:[#allocation18_spill] sm:$0xff] %v3108_v49  ;;  %v3114_v48 = vadd.f32 %v2361_v10, %v2360_v61 }
 0x140   : > { %4123 = vst [vmem:[#allocation19_spill] sm:$0xff] %v3114_v48 }
 0x141   : > { %v933_v53 = vpop.f32.mrb[16].mxu0 }
 0x142   : > { %v2363_v21 = vpop.f32.mrb[40].mxu1  ;;  %v3116_v55 = vadd.f32 %v1046_v32, %v933_v53  ;;  %v935_v45 = vpop.f32.mrb[17].mxu0  ;;  %v3130_v32 = vsub.s32 0, %v1330_v11 }
 0x143   : > { %v2364_v15 = vpop.f32.mrb[41].mxu1  ;;  %v3118_v14 = vadd.f32 %v1048_v24, %v935_v45  ;;  %v937_v1 = vpop.f32.mrb[18].mxu0  ;;  %v1327_v24 = vld [vmem:[%s4067_s2] sm:$0x7]  ;;  %v3135_v45 = vsub.s32 1, %v1330_v11 }
 0x144   : > { %v3120_v13 = vadd.f32 %v2364_v15, %v2363_v21  ;;  %v2366_v19 = vpop.f32.mrb[42].mxu1  ;;  %v3123_v0 = vadd.f32 %v3060_v25, %v937_v1  ;;  %v939_v23 = vpop.f32.mrb[19].mxu0  ;;  %4127 = vst [vmem:[#allocation23_spill] sm:$0xff] %v3130_v32  ;;  %v284_v25 = vunpack.c.l.bf16 %v2960_v40  ;;  %v3142_v1 = vrot.slane %v1327_v24, %v3130_v32 }
 0x145   : > { %v2367_v61 = vpop.f32.mrb[43].mxu1  ;;  %v3126_v43 = vadd.f32 %v3062_v27, %v939_v23  ;;  %4128 = vst [vmem:[#allocation24_spill] sm:$0xff] %v3135_v45  ;;  %v3151_v49 = vrot.slane %v1327_v24, %v3135_v45 }
 0x146   : > { %4124 = vst [vmem:[#allocation20_spill] sm:$0xff] %v3120_v13  ;;  %v3128_v10 = vadd.f32 %v2367_v61, %v2366_v19  ;;  %v285_v19 = vunpack.c.h.bf16 %v2960_v40  ;;  %v4140_v40 = vld [vmem:[#allocation9_spill] sm:$0xff] }
 0x147   : > { %4125 = vst [vmem:[#allocation21_spill] sm:$0xff] %v3126_v43 }
 0x148   : > { %4126 = vst [vmem:[#allocation22_spill] sm:$0xff] %v3128_v10 }
 0x149   : > { %v943_v53 = vpop.f32.mrb[20].mxu0 }
 0x14a   : > { %v2369_v47 = vpop.f32.mrb[44].mxu1  ;;  %v3139_v21 = vadd.f32 %v3064_v42, %v943_v53  ;;  %v945_v15 = vpop.f32.mrb[21].mxu0  ;;  %v287_v42 = vunpack.c.l.bf16 %v2963_v41  ;;  %v288_v53 = vunpack.c.h.bf16 %v2963_v41 }
 0x14b   : > { %v2370_v27 = vpop.f32.mrb[45].mxu1  ;;  %v3146_v23 = vadd.f32 %v3066_v2, %v945_v15  ;;  %v947_v61 = vpop.f32.mrb[22].mxu0 }
 0x14c   : > { %v3148_v48 = vadd.f32 %v2370_v27, %v2369_v47  ;;  %v2372_v10 = vpop.f32.mrb[46].mxu1  ;;  %v3156_v13 = vadd.f32 %v3068_v54, %v947_v61  ;;  %v949_v32 = vpop.f32.mrb[23].mxu0 }
 0x14d   : > { %v2373_v43 = vpop.f32.mrb[47].mxu1  ;;  %v3161_v47 = vadd.f32 %v3070_v29, %v949_v32 }
 0x14e   : > { %4129 = vst [vmem:[#allocation25_spill] sm:$0xff] %v3148_v48  ;;  %v3163_v15 = vadd.f32 %v2373_v43, %v2372_v10  ;;  %v3168_v48 = vsub.s32 2, %v1330_v11 }
 0x150   : > { %4130 = vst [vmem:[#allocation26_spill] sm:$0xff] %v3168_v48  ;;  %v3188_v32 = vrot.slane %v1327_v24, %v3168_v48  ;;  %v1301_v24 = vadd.f32 %v3112_v8, %v288_v53  ;;  %v4147_v48 = vld [vmem:[#allocation12_spill] sm:$0xff] }
 0x151   : > { %v953_v45 = vpop.f32.mrb[24].mxu0 }
 0x152   : > { %v2375_v41 = vpop.f32.mrb[48].mxu1  ;;  %v3183_v2 = vadd.f32 %v3072_v30, %v953_v45  ;;  %v955_v29 = vpop.f32.mrb[25].mxu0  ;;  %v4144_v30 = vunpack.c.h.bf16 %v2986_v44 }
 0x153   : > { %v2376_v27 = vpop.f32.mrb[49].mxu1  ;;  %v3191_v11 = vadd.f32 %v3074_v7, %v955_v29  ;;  %v957_v54 = vpop.f32.mrb[26].mxu0  ;;  %v1297_v29 = vadd.f32 %v3104_v59, %v284_v25  ;;  %v4134_v59 = vunpack.c.l.bf16 %v2973_v4 }
 0x154   : > { %v3193_v51 = vadd.f32 %v2376_v27, %v2375_v41  ;;  %v2378_v61 = vpop.f32.mrb[50].mxu1  ;;  %v3198_v45 = vadd.f32 %v3076_v31, %v957_v54  ;;  %v959_v43 = vpop.f32.mrb[27].mxu0  ;;  %v1298_v31 = vadd.f32 %v3106_v50, %v285_v19  ;;  %v1300_v54 = vadd.f32 %v3110_v34, %v287_v42 }
 0x155   : > { %v2379_v52 = vpop.f32.mrb[51].mxu1  ;;  %v3205_v27 = vadd.f32 %v3078_v35, %v959_v43  ;;  %v3223_v19 = vadd.f32 %v3142_v1, %v1297_v29  ;;  %v1303_v8 = vadd.f32 %v3116_v55, %v4134_v59  ;;  %v4136_v43 = vld [vmem:[#allocation11_spill] sm:$0xff] }
 0x156   : > { %v3207_v41 = vadd.f32 %v2379_v52, %v2378_v61  ;;  %v3229_v10 = vadd.f32 %v3151_v49, %v1298_v31  ;;  %v3236_v29 = vadd.f32 %v3142_v1, %v1300_v54  ;;  %v4139_v54 = vunpack.c.l.bf16 %v2976_v6 }
 0x157   : > { %4131 = vst [vmem:[#allocation27_spill] sm:$0xff] %v3223_v19 }
 0x158   : > { %4132 = vst [vmem:[#allocation28_spill] sm:$0xff] %v3229_v10  ;;  %4133 = vst [vmem:[#allocation29_spill] sm:$0xff] %v3236_v29 }
 0x159   : > { %v963_v42 = vpop.f32.mrb[28].mxu0 }
 0x15a   : > { %v2403_v61 = vpop.f32.mrb[52].mxu1  ;;  %v3232_v52 = vadd.f32 %v3080_v36, %v963_v42  ;;  %v965_v34 = vpop.f32.mrb[29].mxu0  ;;  %v3246_v36 = vadd.f32 %v3151_v49, %v1301_v24 }
 0x15b   : > { %v1225_v50 = vadd.f32 %v2403_v61, %v3092_v58  ;;  %v1216_v25 = vpop.f32.mrb[53].mxu1  ;;  %v3242_v53 = vadd.f32 %v3082_v37, %v965_v34  ;;  %v967_v35 = vpop.f32.mrb[30].mxu0  ;;  %v4138_v58 = vunpack.c.h.bf16 %v2973_v4  ;;  %v1306_v61 = vadd.f32 %v3123_v0, %v4139_v54  ;;  %v4142_v37 = vld [vmem:[#allocation13_spill] sm:$0xff] }
 0x15c   : > { %v1217_v31 = vadd.f32 %v4136_v43, %v1216_v25  ;;  %v2404_v7 = vpop.f32.mrb[54].mxu1  ;;  %4137 = vst [vmem:[#allocation11_spill] sm:$0xff] %v3246_v36  ;;  %v3255_v55 = vadd.f32 %v4140_v40, %v967_v35  ;;  %v969_v34 = vpop.f32.mrb[31].mxu0  ;;  %v4143_v43 = vunpack.c.l.bf16 %v2986_v44  ;;  %v1310_v4 = vadd.f32 %v3146_v23, %v4144_v30  ;;  %v4153_v30 = vld [vmem:[#allocation2_spill] sm:$0xff] }
 0x15d   : > { %4135 = vst [vmem:[#allocation30_spill] sm:$0xff] %v3242_v53  ;;  %v1304_v42 = vadd.f32 %v3118_v14, %v4138_v58  ;;  %v1228_v59 = vadd.f32 %v2404_v7, %v4142_v37  ;;  %v1219_v25 = vpop.f32.mrb[55].mxu1  ;;  %v4145_v14 = vld [vmem:[#allocation10_spill] sm:$0xff]  ;;  %v4148_v40 = vunpack.c.l.bf16 %v2989_v12  ;;  %v4149_v7 = vunpack.c.h.bf16 %v2989_v12  ;;  %v4150_v37 = vld [vmem:[#allocation4_spill] sm:$0xff]  ;;  %v4174_v53 = vld [vmem:[#allocation15_spill] sm:$0xff] }
 0x15e   : > { %4141 = vst [vmem:[#allocation9_spill] sm:$0xff] %v3255_v55  ;;  %v1309_v24 = vadd.f32 %v3139_v21, %v4143_v43  ;;  %v3265_v58 = vadd.f32 %v4145_v14, %v969_v34  ;;  %v1220_v0 = vadd.f32 %v4147_v48, %v1219_v25  ;;  %v4151_v21 = vld [vmem:[#allocation6_spill] sm:$0xff]  ;;  %v4152_v44 = vunpack.c.l.bf16 %v3016_v56 }
 0x15f   : > { %v1312_v35 = vadd.f32 %v3156_v13, %v4148_v40  ;;  %v1313_v54 = vadd.f32 %v3161_v47, %v4149_v7  ;;  %v3285_v12 = vadd.f32 %v3151_v49, %v1304_v42  ;;  %v1427_v13 = vadd.f32 %v3246_v36, %v3236_v29  ;;  %v4159_v40 = vld [vmem:[#allocation21_spill] sm:$0xff]  ;;  %v4168_v36 = vld [vmem:[#allocation14_spill] sm:$0xff] }
 0x160   : > { %4146 = vst [vmem:[#allocation13_spill] sm:$0xff] %v3265_v58  ;;  %v1281_v23 = vadd.f32 %v1217_v31, %v4152_v44  ;;  %v3282_v58 = vadd.f32 %v3142_v1, %v1303_v8  ;;  %v1422_v47 = vadd.f32 %v3229_v10, %v3223_v19  ;;  %v3292_v56 = vadd.f32 %v3142_v1, %v1306_v61 }
 0x161   : > { %4156 = vst [vmem:[#allocation12_spill] sm:$0xff] %v3285_v12  ;;  %v4158_v31 = vunpack.c.h.bf16 %v2976_v6  ;;  %v3298_v44 = vadd.f32 %v3142_v1, %v1309_v24  ;;  %v3301_v8 = vadd.f32 %v3151_v49, %v1310_v4  ;;  %v1006_v42 = vpop.f32.mrb[0].mxu0  ;;  %v3304_v55 = vadd.f32 %v3142_v1, %v1312_v35  ;;  %v4165_v6 = vld [vmem:[#allocation16_spill] sm:$0xff] }
 0x162   : > { %4155 = vst [vmem:[#allocation10_spill] sm:$0xff] %v3282_v58  ;;  %4157 = vst [vmem:[#allocation4_spill] sm:$0xff] %v3292_v56  ;;  %v2407_v25 = vpop.f32.mrb[56].mxu1  ;;  %v3307_v34 = vadd.f32 %v3151_v49, %v1313_v54  ;;  %v4164_v61 = vunpack.c.l.bf16 %v2884_v62  ;;  %v4166_v24 = vunpack.c.l.bf16 %v3027_v60  ;;  %v4167_v4 = vunpack.c.h.bf16 %v2884_v62 }
 0x163   : > { %v1307_v7 = vadd.f32 %v4159_v40, %v4158_v31  ;;  %4160 = vst [vmem:[#allocation6_spill] sm:$0xff] %v3298_v44  ;;  %4161 = vst [vmem:[#allocation2_spill] sm:$0xff] %v3301_v8  ;;  %v1241_v43 = vadd.f32 %v2407_v25, %v4165_v6  ;;  %v1008_v31 = vpop.f32.mrb[1].mxu0  ;;  %v1232_v40 = vpop.f32.mrb[57].mxu1  ;;  %v3320_v54 = vadd.f32 %v3188_v32, %v1281_v23  ;;  %v4169_v25 = vunpack.c.l.bf16 %v2732_v17  ;;  %v4171_v6 = vld [vmem:[#allocation17_spill] sm:$0xff] }
 0x164   : > { %4162 = vst [vmem:[#allocation21_spill] sm:$0xff] %v3304_v55  ;;  %4163 = vst [vmem:[#allocation31_spill] sm:$0xff] %v3307_v34  ;;  %v1279_v14 = vadd.f32 %v1006_v42, %v4164_v61  ;;  %v1287_v10 = vadd.f32 %v1225_v50, %v4166_v24  ;;  %v1280_v19 = vadd.f32 %v1008_v31, %v4167_v4  ;;  %v1010_v35 = vpop.f32.mrb[2].mxu0  ;;  %v2408_v56 = vpop.f32.mrb[58].mxu1  ;;  %v4170_v60 = vunpack.c.l.bf16 %v2887_v63 }
 0x165   : > { %v3317_v29 = vadd.f32 %v4168_v36, %v1232_v40  ;;  %v1299_v61 = vadd.f32 %v1241_v43, %v4169_v25  ;;  %v1244_v62 = vadd.f32 %v2408_v56, %v4171_v6  ;;  %v1012_v31 = vpop.f32.mrb[3].mxu0  ;;  %v1235_v24 = vpop.f32.mrb[59].mxu1  ;;  %v4172_v36 = vunpack.c.l.bf16 %v3019_v57 }
 0x166   : > { %v3323_v42 = vadd.f32 %v3142_v1, %v1279_v14  ;;  %v1282_v50 = vadd.f32 %v1010_v35, %v4170_v60  ;;  %v3333_v4 = vadd.f32 %v3151_v49, %v1280_v19  ;;  %v4173_v23 = vunpack.c.h.bf16 %v2887_v63 }
 0x167   : > { %v1284_v40 = vadd.f32 %v1220_v0, %v4172_v36  ;;  %v3338_v48 = vadd.f32 %v4174_v53, %v1235_v24  ;;  %v3341_v17 = vadd.f32 %v3151_v49, %v1307_v7  ;;  %v4175_v43 = vunpack.c.l.bf16 %v2735_v18 }
 0x168   : > { %v1283_v14 = vadd.f32 %v1012_v31, %v4173_v23  ;;  %v3346_v35 = vadd.f32 %v3188_v32, %v1299_v61  ;;  %v3350_v57 = vadd.f32 %v3285_v12, %v3282_v58  ;;  %v3353_v19 = vadd.f32 %v3142_v1, %v1282_v50 }
 0x169   : > { %v1302_v56 = vadd.f32 %v1244_v62, %v4175_v43  ;;  %v1392_v53 = vadd.f32 %v3333_v4, %v3323_v42  ;;  %v3362_v18 = vadd.f32 %v3301_v8, %v3298_v44  ;;  %v1393_v0 = vsel %vm834_vm0, %v3320_v54, 0.0  ;;  %v1016_v6 = vpop.f32.mrb[4].mxu0  ;;  %v4178_v43 = vld [vmem:[#allocation20_spill] sm:$0xff]  ;;  %v4186_v8 = vld [vmem:[#allocation19_spill] sm:$0xff] }
 0x16a   : > { %v3356_v63 = vadd.f32 %v3151_v49, %v1283_v14  ;;  %v1423_v25 = vsel %vm834_vm0, %v3346_v35, 0.0  ;;  %v3373_v61 = vadd.f32 %v3307_v34, %v3304_v55  ;;  %v4176_v60 = vunpack.c.l.bf16 %v3030_v3  ;;  %v2411_v62 = vpop.f32.mrb[60].mxu1  ;;  %v1018_v12 = vpop.f32.mrb[5].mxu0 }
 0x16b   : > { %v3367_v7 = vadd.f32 %v3188_v32, %v1302_v56  ;;  %v1394_v31 = vadd.f32 %v1393_v0, %v1392_v53  ;;  %v3378_v24 = vadd.f32 %v3188_v32, %v1287_v10  ;;  %v3381_v36 = vadd.f32 %v3188_v32, %v1284_v40  ;;  %v1248_v58 = vpop.f32.mrb[61].mxu1  ;;  %v4180_v0 = vld [vmem:[#allocation18_spill] sm:$0xff]  ;;  %v1020_v34 = vpop.f32.mrb[6].mxu0 }
 0x16c   : > { %v1290_v50 = vadd.f32 %v1228_v59, %v4176_v60  ;;  %v4177_v23 = vunpack.c.l.bf16 %v2920_v20  ;;  %v1257_v56 = vadd.f32 %v2411_v62, %v4178_v43  ;;  %v1424_v59 = vadd.f32 %v1423_v25, %v1422_v47  ;;  %v2412_v55 = vpop.f32.mrb[62].mxu1 }
 0x16d   : > { %v1428_v3 = vsel %vm834_vm0, %v3367_v7, 0.0  ;;  %v4179_v60 = vunpack.c.h.bf16 %v2920_v20  ;;  %v1249_v10 = vadd.f32 %v4180_v0, %v1248_v58  ;;  %1395 = vadd.xlane.f32.xlu0 %v1394_v31  ;;  %v4182_v47 = vunpack.c.l.bf16 %v2923_v22  ;;  %v4183_v20 = vld [vmem:[#allocation22_spill] sm:$0xff]  ;;  %v1251_v58 = vpop.f32.mrb[63].mxu1 }
 0x16e   : > { %v1285_v14 = vadd.f32 %v1016_v6, %v4177_v23  ;;  %v1429_v40 = vadd.f32 %v1428_v3, %v1427_v13  ;;  %v1397_v6 = vadd.f32 %v3356_v63, %v3353_v19  ;;  %v4181_v23 = vunpack.c.l.bf16 %v2805_v38 }
 0x16f   : > { %v1286_v53 = vadd.f32 %v1018_v12, %v4179_v60  ;;  %v1288_v25 = vadd.f32 %v1020_v34, %v4182_v47  ;;  %v1260_v12 = vadd.f32 %v2412_v55, %v4183_v20  ;;  %v1022_v60 = vpop.f32.mrb[7].mxu0  ;;  %v4184_v13 = vunpack.c.l.bf16 %v2762_v26 }
 0x170   : > { %v3394_v62 = vadd.f32 %v3142_v1, %v1285_v14  ;;  %v1311_v43 = vadd.f32 %v1257_v56, %v4181_v23  ;;  %v4185_v3 = vunpack.c.h.bf16 %v2923_v22  ;;  %v1252_v44 = vadd.f32 %v4186_v8, %v1251_v58  ;;  %1430 = vadd.xlane.f32.xlu1 %v1429_v40 }
 0x171   : > { %v3402_v0 = vadd.f32 %v3151_v49, %v1286_v53  ;;  %v1305_v31 = vadd.f32 %v1249_v10, %v4184_v13  ;;  %v4187_v38 = vunpack.c.l.bf16 %v2996_v16  ;;  %v3413_v55 = vadd.f32 %v3142_v1, %v1288_v25  ;;  %1425 = vadd.xlane.f32.xlu0 %v1424_v59  ;;  %v1026_v47 = vpop.f32.mrb[8].mxu0 }
 0x172   : > { %v1289_v14 = vadd.f32 %v1022_v60, %v4185_v3  ;;  %v4188_v56 = vunpack.c.l.bf16 %v2808_v39  ;;  %v3418_v23 = vadd.f32 %v3188_v32, %v1311_v43  ;;  %v4189_v26 = vunpack.c.h.bf16 %v2996_v16  ;;  %v2415_v25 = vpop.f32.mrb[64].mxu1 }
 0x173   : > { %v1315_v34 = vadd.f32 %v3183_v2, %v4187_v38  ;;  %v1402_v2 = vadd.f32 %v3402_v0, %v3394_v62  ;;  %v3429_v10 = vadd.f32 %v3188_v32, %v1290_v50  ;;  %v1403_v39 = vsel %vm834_vm0, %v3378_v24, 0.0  ;;  %v1264_v38 = vpop.f32.mrb[65].mxu1 }
 0x174   : > { %v1314_v53 = vadd.f32 %v1260_v12, %v4188_v56  ;;  %v1316_v22 = vadd.f32 %v3191_v11, %v4189_v26  ;;  %v3424_v8 = vadd.f32 %v3151_v49, %v1289_v14  ;;  %v1398_v40 = vsel %vm834_vm0, %v3381_v36, 0.0  ;;  %v1028_v14 = vpop.f32.mrb[9].mxu0 }
 0x175   : > { %v1443_v16 = vsel %vm834_vm0, %v3418_v23, 0.0  ;;  %v3438_v11 = vadd.f32 %v3188_v32, %v1305_v31  ;;  %v4190_v59 = vunpack.c.l.bf16 %v3033_v5  ;;  %v1404_v50 = vadd.f32 %v1403_v39, %v1402_v2  ;;  %v2416_v2 = vpop.f32.mrb[66].mxu1  ;;  %v1030_v39 = vpop.f32.mrb[10].mxu0 }
 0x176   : > { %v1399_v20 = vadd.f32 %v1398_v40, %v1397_v6  ;;  %v1407_v12 = vadd.f32 %v3424_v8, %v3413_v55  ;;  %v4191_v60 = vunpack.c.l.bf16 %v2770_v28  ;;  %v4192_v13 = vunpack.c.l.bf16 %v2945_v33  ;;  %v4194_v6 = vld [vmem:[#allocation25_spill] sm:$0xff]  ;;  %v1032_v40 = vpop.f32.mrb[11].mxu0 }
 0x177   : > { %v1293_v43 = vadd.f32 %v3317_v29, %v4190_v59  ;;  %v1273_v31 = vadd.f32 %v2415_v25, %v3193_v51  ;;  %v3451_v5 = vadd.f32 %v3188_v32, %v1314_v53  ;;  %v4193_v29 = vunpack.c.h.bf16 %v2945_v33  ;;  %1405 = vadd.xlane.f32.xlu1 %v1404_v50  ;;  %v1267_v59 = vpop.f32.mrb[67].mxu1 }
 0x178   : > { %v1308_v58 = vadd.f32 %v1252_v44, %v4191_v60  ;;  %v1291_v3 = vadd.f32 %v1026_v47, %v4192_v13  ;;  %v1265_v26 = vadd.f32 %v4194_v6, %v1264_v38  ;;  %1400 = vadd.xlane.f32.xlu0 %v1399_v20  ;;  %v1408_v28 = vsel %vm834_vm0, %v3429_v10, 0.0  ;;  %v4201_v6 = vld [vmem:[#allocation7_spill] sm:$0xff] }
 0x179   : > { %v1292_v56 = vadd.f32 %v1028_v14, %v4193_v29  ;;  %v1444_v44 = vadd.f32 %v1443_v16, %v3362_v18  ;;  %v1276_v53 = vadd.f32 %v2416_v2, %v3207_v41  ;;  %v1409_v33 = vadd.f32 %v1408_v28, %v1407_v12 }
 0x17a   : > { %v3460_v51 = vadd.f32 %v3142_v1, %v1291_v3  ;;  %v1433_v47 = vsel %vm834_vm0, %v3438_v11, 0.0  ;;  %v4195_v50 = vunpack.c.l.bf16 %v4151_v21  ;;  %v4196_v60 = vunpack.c.h.bf16 %v4151_v21 }
 0x17b   : > { %v3466_v25 = vadd.f32 %v3151_v49, %v1292_v56  ;;  %v1268_v16 = vadd.f32 %v3163_v15, %v1267_v59  ;;  %v3474_v13 = vadd.f32 %v3142_v1, %v1315_v34  ;;  %v4197_v41 = vunpack.c.l.bf16 %v4153_v30  ;;  %v4200_v56 = vld [vmem:[#allocation5_spill] sm:$0xff]  ;;  %1410 = vadd.xlane.f32.xlu1 %v1409_v33 }
 0x17c   : > { %v1294_v20 = vadd.f32 %v1030_v39, %v4195_v50  ;;  %v1295_v18 = vadd.f32 %v1032_v40, %v4196_v60  ;;  %v1448_v3 = vsel %vm834_vm0, %v3451_v5, 0.0  ;;  %v3481_v14 = vadd.f32 %v3188_v32, %v1308_v58  ;;  %1445 = vadd.xlane.f32.xlu0 %v1444_v44 }
 0x17d   : > { %v1317_v12 = vadd.f32 %v1265_v26, %v4197_v41  ;;  %v3484_v38 = vadd.f32 %v3151_v49, %v1316_v22  ;;  %v4198_v21 = vunpack.c.l.bf16 %v2999_v46  ;;  %v4199_v15 = vunpack.c.h.bf16 %v2999_v46 }
 0x17e   : > { %v313_v30 = vunpack.c.l.bf16 %v4200_v56  ;;  %v4202_v26 = vunpack.c.l.bf16 %v4201_v6  ;;  %v4203_v2 = vunpack.c.l.bf16 %v3036_v9  ;;  %v1434_v39 = vadd.f32 %v1433_v47, %v3350_v57  ;;  %v4208_v47 = vld [vmem:[#allocation30_spill] sm:$0xff] }
 0x17f   : > { %v1318_v29 = vadd.f32 %v3198_v45, %v4198_v21  ;;  %v1319_v34 = vadd.f32 %v3205_v27, %v4199_v15  ;;  %v3501_v45 = vadd.f32 %v3188_v32, %v1293_v43  ;;  %v3504_v46 = vadd.f32 %v3142_v1, %v1294_v20  ;;  %v4209_v20 = vld [vmem:[#allocation8_spill] sm:$0xff] }
 0x180   : > { %v1321_v58 = vadd.f32 %v3232_v52, %v4202_v26  ;;  %v1296_v22 = vadd.f32 %v3338_v48, %v4203_v2  ;;  %v3507_v27 = vadd.f32 %v3151_v49, %v1295_v18  ;;  %v1449_v28 = vadd.f32 %v1448_v3, %v3373_v61  ;;  %v4205_v48 = vld [vmem:[#allocation3_spill] sm:$0xff]  ;;  %1435 = vadd.xlane.f32.xlu0 %v1434_v39 }
 0x181   : > { %v1412_v52 = vadd.f32 %v3466_v25, %v3460_v51  ;;  %v4204_v9 = vunpack.c.l.bf16 %v4150_v37  ;;  %v4206_v40 = vunpack.c.l.bf16 %v4205_v48  ;;  %v1438_v43 = vsel %vm834_vm0, %v3481_v14, 0.0  ;;  %v4210_v37 = vld [vmem:[#allocation4_spill] sm:$0xff] }
 0x182   : > { %v3519_v59 = vadd.f32 %v3188_v32, %v1317_v12  ;;  %v3522_v33 = vadd.f32 %v3142_v1, %v1318_v29  ;;  %v4207_v61 = vunpack.c.h.bf16 %v4201_v6  ;;  %v312_v60 = vunpack.c.h.bf16 %v4209_v20  ;;  %1450 = vadd.xlane.f32.xlu1 %v1449_v28  ;;  %v4213_v28 = vld [vmem:[#allocation13_spill] sm:$0xff] }
 0x183   : > { %v1323_v44 = vadd.f32 %v1273_v31, %v4204_v9  ;;  %v1320_v57 = vadd.f32 %v1268_v16, %v4206_v40  ;;  %v1437_v31 = vadd.f32 %v3341_v17, %v4210_v37  ;;  %v3531_v18 = vadd.f32 %v3151_v49, %v1319_v34 }
 0x184   : > { %v1322_v50 = vadd.f32 %v4208_v47, %v4207_v61  ;;  %v1413_v16 = vsel %vm834_vm0, %v3501_v45, 0.0  ;;  %v3536_v41 = vadd.f32 %v3188_v32, %v1296_v22  ;;  %v1452_v12 = vadd.f32 %v3484_v38, %v3474_v13  ;;  %v4212_v22 = vld [vmem:[#allocation9_spill] sm:$0xff] }
 0x185   : > { %v3541_v3 = vadd.f32 %v3142_v1, %v1321_v58  ;;  %v1439_v21 = vadd.f32 %v1438_v43, %v1437_v31  ;;  %v1414_v29 = vadd.f32 %v1413_v16, %v1412_v52  ;;  %v1417_v15 = vadd.f32 %v3507_v27, %v3504_v46 }
 0x186   : > { %v1326_v56 = vadd.f32 %v1276_v53, %v313_v30  ;;  %v1453_v34 = vsel %vm834_vm0, %v3519_v59, 0.0  ;;  %v3548_v6 = vadd.f32 %v3188_v32, %v1320_v57  ;;  %v3551_v26 = vadd.f32 %v3188_v32, %v1323_v44 }
 0x187   : > { %v3554_v2 = vadd.f32 %v3151_v49, %v1322_v50  ;;  %v4211_v58 = vunpack.c.l.bf16 %v4209_v20  ;;  %v1325_v52 = vadd.f32 %v4213_v28, %v312_v60  ;;  %1440 = vadd.xlane.f32.xlu1 %v1439_v21  ;;  %1415 = vadd.xlane.f32.xlu0 %v1414_v29  ;;  %v1418_v53 = vsel %vm834_vm0, %v3536_v41, 0.0 }
 0x188   : > { %v1419_v30 = vadd.f32 %v1418_v53, %v1417_v15  ;;  %v1454_v9 = vadd.f32 %v1453_v34, %v1452_v12  ;;  %v1457_v44 = vadd.f32 %v3531_v18, %v3522_v33  ;;  %v1458_v48 = vsel %vm834_vm0, %v3548_v6, 0.0  ;;  %v4214_v34 = vld [vmem:[#allocation29_spill] sm:$0xff]  ;;  %v4218_v53 = vld [vmem:[#allocation27_spill] sm:$0xff] }
 0x189   : > { %v1324_v39 = vadd.f32 %v4212_v22, %v4211_v58  ;;  %v1463_v40 = vsel %vm834_vm0, %v3551_v26, 0.0  ;;  %v3569_v57 = vadd.f32 %v3188_v32, %v1326_v56  ;;  %v3575_v61 = vadd.f32 %v3151_v49, %v1325_v52  ;;  %v4215_v22 = vld [vmem:[#allocation11_spill] sm:$0xff] }
 0x18a   : > { %v1462_v47 = vadd.f32 %v3554_v2, %v3541_v3  ;;  %v1459_v50 = vadd.f32 %v1458_v48, %v1457_v44 }
 0x18b   : > { %v3572_v43 = vadd.f32 %v3142_v1, %v1324_v39  ;;  %1420 = vadd.xlane.f32.xlu1 %v1419_v30  ;;  %1455 = vadd.xlane.f32.xlu0 %v1454_v9  ;;  %v1468_v60 = vsel %vm834_vm0, %v3569_v57, 0.0  ;;  %v4219_v9 = vld [vmem:[#allocation28_spill] sm:$0xff] }
 0x18c   : > { %v1464_v20 = vadd.f32 %v1463_v40, %v1462_v47 }
 0x18d   : > { %v1467_v32 = vadd.f32 %v3575_v61, %v3572_v43 }
 0x18f   : > { %1460 = vadd.xlane.f32.xlu1 %v1459_v50  ;;  %1465 = vadd.xlane.f32.xlu0 %v1464_v20  ;;  %v1469_v1 = vadd.f32 %v1468_v60, %v1467_v32 }
 0x193   : > { %1470 = vadd.xlane.f32.xlu1 %v1469_v1 }
 0x1fa   : > { %v1396_v31 = vpop.xlane.xlu0 %1395 }
 0x1fb   : > { %v1473_v49 = vmul.f32 0.003125, %v1396_v31 }
 0x1fd   : > { %v1431_v16 = vpop.xlane.xlu1 %1430  ;;  %v3584_v12 = vsub.f32 %v3323_v42, %v1473_v49  ;;  %v3587_v21 = vsub.f32 %v3333_v4, %v1473_v49  ;;  %v3590_v29 = vsub.f32 %v3320_v54, %v1473_v49 }
 0x1fe   : > { %v1480_v15 = vmul.f32 0.003125, %v1431_v16  ;;  %v1426_v56 = vpop.xlane.xlu0 %1425 }
 0x1ff   : > { %v1479_v52 = vmul.f32 0.003125, %v1426_v56  ;;  %v1537_v42 = vmul.f32 %v3584_v12, %v3584_v12  ;;  %v1538_v4 = vmul.f32 %v3587_v21, %v3587_v21  ;;  %v1539_v54 = vmul.f32 %v3590_v29, %v3590_v29 }
 0x200   : > { %v3593_v58 = vsub.f32 %v4214_v34, %v1480_v15  ;;  %v3596_v39 = vsub.f32 %v4215_v22, %v1480_v15  ;;  %v3599_v28 = vsub.f32 %v3367_v7, %v1480_v15 }
 0x201   : > { %v3608_v30 = vsub.f32 %v4218_v53, %v1479_v52  ;;  %v3611_v44 = vsub.f32 %v4219_v9, %v1479_v52  ;;  %v3614_v48 = vsub.f32 %v3346_v35, %v1479_v52  ;;  %v1585_v50 = vadd.f32 %v1538_v4, %v1537_v42 }
 0x202   : > { %4216 = vst [vmem:[#allocation16_spill] sm:$0xff] %v3596_v39  ;;  %4217 = vst [vmem:[#allocation14_spill] sm:$0xff] %v3599_v28  ;;  %v1558_v7 = vmul.f32 %v3593_v58, %v3593_v58  ;;  %v1586_v20 = vsel %vm834_vm0, %v1539_v54, 0.0  ;;  %v1559_v60 = vmul.f32 %v3596_v39, %v3596_v39  ;;  %v1560_v32 = vmul.f32 %v3599_v28, %v3599_v28 }
 0x203   : > { %v1555_v35 = vmul.f32 %v3608_v30, %v3608_v30  ;;  %v1556_v49 = vmul.f32 %v3611_v44, %v3611_v44  ;;  %v1587_v16 = vadd.f32 %v1586_v20, %v1585_v50  ;;  %v1557_v15 = vmul.f32 %v3614_v48, %v3614_v48 }
 0x204   : > { %v1406_v40 = vpop.xlane.xlu1 %1405  ;;  %v1620_v56 = vadd.f32 %v1559_v60, %v1558_v7  ;;  %v1621_v34 = vsel %vm834_vm0, %v1560_v32, 0.0 }
 0x205   : > { %v1401_v47 = vpop.xlane.xlu0 %1400  ;;  %v1475_v1 = vmul.f32 0.003125, %v1406_v40  ;;  %1588 = vadd.xlane.f32.xlu0 %v1587_v16  ;;  %v1616_v40 = vsel %vm834_vm0, %v1557_v15, 0.0 }
 0x206   : > { %v1474_v31 = vmul.f32 0.003125, %v1401_v47  ;;  %v1622_v28 = vadd.f32 %v1621_v34, %v1620_v56 }
 0x207   : > { %v3631_v22 = vsub.f32 %v3394_v62, %v1475_v1  ;;  %v3634_v52 = vsub.f32 %v3402_v0, %v1475_v1  ;;  %v3637_v42 = vsub.f32 %v3378_v24, %v1475_v1  ;;  %v1615_v62 = vadd.f32 %v1556_v49, %v1555_v35  ;;  %v4222_v49 = vld [vmem:[#allocation2_spill] sm:$0xff] }
 0x208   : > { %v3640_v4 = vsub.f32 %v3353_v19, %v1474_v31  ;;  %v3643_v54 = vsub.f32 %v3356_v63, %v1474_v31  ;;  %v3646_v53 = vsub.f32 %v3381_v36, %v1474_v31  ;;  %v1411_v9 = vpop.xlane.xlu1 %1410  ;;  %v4221_v31 = vld [vmem:[#allocation6_spill] sm:$0xff] }
 0x209   : > { %v1446_v7 = vpop.xlane.xlu0 %1445  ;;  %v1476_v0 = vmul.f32 0.003125, %v1411_v9  ;;  %v1543_v24 = vmul.f32 %v3631_v22, %v3631_v22  ;;  %v1544_v19 = vmul.f32 %v3634_v52, %v3634_v52  ;;  %v1617_v50 = vadd.f32 %v1616_v40, %v1615_v62 }
 0x20a   : > { %v1483_v47 = vmul.f32 0.003125, %v1446_v7  ;;  %v1545_v63 = vmul.f32 %v3637_v42, %v3637_v42  ;;  %v1540_v36 = vmul.f32 %v3640_v4, %v3640_v4  ;;  %v1541_v20 = vmul.f32 %v3643_v54, %v3643_v54 }
 0x20b   : > { %v3660_v60 = vsub.f32 %v3413_v55, %v1476_v0  ;;  %v3663_v32 = vsub.f32 %v3424_v8, %v1476_v0  ;;  %v3666_v1 = vsub.f32 %v3429_v10, %v1476_v0  ;;  %1618 = vadd.xlane.f32.xlu0 %v1617_v50  ;;  %v1595_v55 = vadd.f32 %v1544_v19, %v1543_v24  ;;  %v4224_v24 = vld [vmem:[#allocation31_spill] sm:$0xff] }
 0x20c   : > { %v3669_v35 = vsub.f32 %v4221_v31, %v1483_v47  ;;  %v3672_v16 = vsub.f32 %v4222_v49, %v1483_v47  ;;  %v3675_v15 = vsub.f32 %v3418_v23, %v1483_v47  ;;  %v1596_v62 = vsel %vm834_vm0, %v1545_v63, 0.0  ;;  %v4223_v47 = vld [vmem:[#allocation21_spill] sm:$0xff] }
 0x20d   : > { %4220 = vst [vmem:[#allocation17_spill] sm:$0xff] %v3666_v1  ;;  %v1436_v7 = vpop.xlane.xlu0 %1435  ;;  %v1542_v10 = vmul.f32 %v3646_v53, %v3646_v53  ;;  %v1590_v0 = vadd.f32 %v1541_v20, %v1540_v36  ;;  %v1597_v31 = vadd.f32 %v1596_v62, %v1595_v55  ;;  %v4226_v36 = vld [vmem:[#allocation12_spill] sm:$0xff] }
 0x20e   : > { %v1481_v40 = vmul.f32 0.003125, %v1436_v7  ;;  %v1567_v49 = vmul.f32 %v3669_v35, %v3669_v35  ;;  %v1568_v23 = vmul.f32 %v3672_v16, %v3672_v16 }
 0x20f   : > { %v1451_v9 = vpop.xlane.xlu1 %1450  ;;  %1598 = vadd.xlane.f32.xlu0 %v1597_v31  ;;  %v1591_v20 = vsel %vm834_vm0, %v1542_v10, 0.0 }
 0x210   : > { %v1484_v8 = vmul.f32 0.003125, %v1451_v9  ;;  %v4225_v9 = vld [vmem:[#allocation10_spill] sm:$0xff]  ;;  %v3697_v56 = vsub.f32 %v4226_v36, %v1481_v40  ;;  %v3700_v34 = vsub.f32 %v3438_v11, %v1481_v40  ;;  %v1635_v39 = vadd.f32 %v1568_v23, %v1567_v49 }
 0x211   : > { %v3694_v7 = vsub.f32 %v4225_v9, %v1481_v40  ;;  %v1546_v36 = vmul.f32 %v3660_v60, %v3660_v60  ;;  %v1547_v11 = vmul.f32 %v3663_v32, %v3663_v32  ;;  %v1548_v40 = vmul.f32 %v3666_v1, %v3666_v1 }
 0x212   : > { %v3685_v50 = vsub.f32 %v4223_v47, %v1484_v8  ;;  %v3688_v19 = vsub.f32 %v4224_v24, %v1484_v8  ;;  %v3691_v63 = vsub.f32 %v3451_v5, %v1484_v8  ;;  %v1569_v47 = vmul.f32 %v3675_v15, %v3675_v15 }
 0x213   : > { %v1592_v24 = vadd.f32 %v1591_v20, %v1590_v0 }
 0x214   : > { %v1441_v55 = vpop.xlane.xlu1 %1440  ;;  %v1416_v62 = vpop.xlane.xlu0 %1415  ;;  %v1636_v9 = vsel %vm834_vm0, %v1569_v47, 0.0 }
 0x215   : > { %v1482_v5 = vmul.f32 0.003125, %v1441_v55  ;;  %v1477_v8 = vmul.f32 0.003125, %v1416_v62  ;;  %1593 = vadd.xlane.f32.xlu1 %v1592_v24  ;;  %v1637_v55 = vadd.f32 %v1636_v9, %v1635_v39  ;;  %v1570_v39 = vmul.f32 %v3685_v50, %v3685_v50 }
 0x217   : > { %v3713_v10 = vsub.f32 %v4210_v37, %v1482_v5  ;;  %v3716_v0 = vsub.f32 %v3341_v17, %v1482_v5  ;;  %v3719_v31 = vsub.f32 %v3481_v14, %v1482_v5  ;;  %v3722_v49 = vsub.f32 %v3460_v51, %v1477_v8  ;;  %1638 = vadd.xlane.f32.xlu0 %v1637_v55 }
 0x218   : > { %v3725_v23 = vsub.f32 %v3466_v25, %v1477_v8  ;;  %v3728_v20 = vsub.f32 %v3501_v45, %v1477_v8  ;;  %v1421_v62 = vpop.xlane.xlu1 %1420  ;;  %v1456_v47 = vpop.xlane.xlu0 %1455  ;;  %v1600_v37 = vadd.f32 %v1547_v11, %v1546_v36  ;;  %v1601_v17 = vsel %vm834_vm0, %v1548_v40, 0.0 }
 0x219   : > { %v1478_v24 = vmul.f32 0.003125, %v1421_v62  ;;  %v1485_v1 = vmul.f32 0.003125, %v1456_v47  ;;  %v1561_v14 = vmul.f32 %v3694_v7, %v3694_v7  ;;  %v1562_v25 = vmul.f32 %v3697_v56, %v3697_v56  ;;  %1623 = vadd.xlane.f32.xlu1 %v1622_v28 }
 0x21a   : > { %v1602_v51 = vadd.f32 %v1601_v17, %v1600_v37  ;;  %v1563_v45 = vmul.f32 %v3700_v34, %v3700_v34 }
 0x21b   : > { %v3740_v5 = vsub.f32 %v3504_v46, %v1478_v24  ;;  %v3743_v8 = vsub.f32 %v3507_v27, %v1478_v24  ;;  %v3746_v9 = vsub.f32 %v3536_v41, %v1478_v24  ;;  %v3749_v36 = vsub.f32 %v3474_v13, %v1485_v1 }
 0x21c   : > { %v3752_v11 = vsub.f32 %v3484_v38, %v1485_v1  ;;  %v3755_v40 = vsub.f32 %v3519_v59, %v1485_v1  ;;  %v1625_v55 = vadd.f32 %v1562_v25, %v1561_v14  ;;  %v1626_v28 = vsel %vm834_vm0, %v1563_v45, 0.0  ;;  %v1461_v46 = vpop.xlane.xlu1 %1460  ;;  %v1466_v62 = vpop.xlane.xlu0 %1465 }
 0x21d   : > { %v1486_v47 = vmul.f32 0.003125, %v1461_v46  ;;  %v1487_v27 = vmul.f32 0.003125, %v1466_v62  ;;  %v1571_v41 = vmul.f32 %v3688_v19, %v3688_v19  ;;  %v1572_v13 = vmul.f32 %v3691_v63, %v3691_v63  ;;  %1603 = vadd.xlane.f32.xlu1 %v1602_v51 }
 0x21e   : > { %v1627_v37 = vadd.f32 %v1626_v28, %v1625_v55  ;;  %v1549_v38 = vmul.f32 %v3722_v49, %v3722_v49  ;;  %v1550_v59 = vmul.f32 %v3725_v23, %v3725_v23  ;;  %v1551_v1 = vmul.f32 %v3728_v20, %v3728_v20 }
 0x21f   : > { %v3769_v24 = vsub.f32 %v3522_v33, %v1486_v47  ;;  %v3772_v17 = vsub.f32 %v3531_v18, %v1486_v47  ;;  %v3775_v14 = vsub.f32 %v3548_v6, %v1486_v47  ;;  %v3778_v25 = vsub.f32 %v3541_v3, %v1487_v27 }
 0x220   : > { %1628 = vadd.xlane.f32.xlu0 %v1627_v37  ;;  %v3781_v45 = vsub.f32 %v3554_v2, %v1487_v27  ;;  %v3784_v55 = vsub.f32 %v3551_v26, %v1487_v27  ;;  %v1640_v51 = vadd.f32 %v1571_v41, %v1570_v39  ;;  %v1641_v33 = vsel %vm834_vm0, %v1572_v13, 0.0  ;;  %v1471_v28 = vpop.xlane.xlu1 %1470 }
 0x221   : > { %v1605_v46 = vadd.f32 %v1550_v59, %v1549_v38  ;;  %v1606_v18 = vsel %vm834_vm0, %v1551_v1, 0.0  ;;  %v1488_v62 = vmul.f32 0.003125, %v1471_v28  ;;  %v1564_v6 = vmul.f32 %v3713_v10, %v3713_v10 }
 0x222   : > { %v1642_v3 = vadd.f32 %v1641_v33, %v1640_v51  ;;  %v1565_v47 = vmul.f32 %v3716_v0, %v3716_v0  ;;  %v1566_v2 = vmul.f32 %v3719_v31, %v3719_v31  ;;  %v1573_v26 = vmul.f32 %v3749_v36, %v3749_v36 }
 0x223   : > { %v1607_v39 = vadd.f32 %v1606_v18, %v1605_v46  ;;  %v3797_v27 = vsub.f32 %v3572_v43, %v1488_v62  ;;  %v3800_v41 = vsub.f32 %v3575_v61, %v1488_v62  ;;  %v3803_v13 = vsub.f32 %v3569_v57, %v1488_v62 }
 0x224   : > { %1643 = vadd.xlane.f32.xlu1 %v1642_v3  ;;  %v1630_v37 = vadd.f32 %v1565_v47, %v1564_v6  ;;  %v1631_v38 = vsel %vm834_vm0, %v1566_v2, 0.0  ;;  %v1574_v59 = vmul.f32 %v3752_v11, %v3752_v11  ;;  %v1575_v1 = vmul.f32 %v3755_v40, %v3755_v40 }
 0x225   : > { %4227 = vst [vmem:[#allocation15_spill] sm:$0xff] %v3800_v41  ;;  %4228 = vst [vmem:[#allocation20_spill] sm:$0xff] %v3803_v13  ;;  %1608 = vadd.xlane.f32.xlu0 %v1607_v39  ;;  %v1552_v43 = vmul.f32 %v3740_v5, %v3740_v5  ;;  %v1553_v61 = vmul.f32 %v3743_v8, %v3743_v8  ;;  %v1554_v57 = vmul.f32 %v3746_v9, %v3746_v9 }
 0x226   : > { %v1579_v51 = vmul.f32 %v3778_v25, %v3778_v25  ;;  %v1632_v33 = vadd.f32 %v1631_v38, %v1630_v37  ;;  %v1645_v28 = vadd.f32 %v1574_v59, %v1573_v26  ;;  %v1646_v46 = vsel %vm834_vm0, %v1575_v1, 0.0 }
 0x227   : > { %v1580_v18 = vmul.f32 %v3781_v45, %v3781_v45  ;;  %v1610_v62 = vadd.f32 %v1553_v61, %v1552_v43  ;;  %v1611_v6 = vsel %vm834_vm0, %v1554_v57, 0.0  ;;  %v1581_v3 = vmul.f32 %v3784_v55, %v3784_v55 }
 0x228   : > { %v1576_v47 = vmul.f32 %v3769_v24, %v3769_v24  ;;  %1633 = vadd.xlane.f32.xlu1 %v1632_v33  ;;  %v1647_v2 = vadd.f32 %v1646_v46, %v1645_v28  ;;  %v1577_v26 = vmul.f32 %v3772_v17, %v3772_v17  ;;  %v1578_v37 = vmul.f32 %v3775_v14, %v3775_v14 }
 0x229   : > { %v1655_v39 = vadd.f32 %v1580_v18, %v1579_v51  ;;  %v1612_v38 = vadd.f32 %v1611_v6, %v1610_v62  ;;  %v1656_v59 = vsel %vm834_vm0, %v1581_v3, 0.0  ;;  %v1582_v61 = vmul.f32 %v3797_v27, %v3797_v27 }
 0x22a   : > { %1648 = vadd.xlane.f32.xlu0 %v1647_v2  ;;  %v1650_v43 = vadd.f32 %v1577_v26, %v1576_v47  ;;  %v1583_v57 = vmul.f32 %v3800_v41, %v3800_v41  ;;  %v1651_v51 = vsel %vm834_vm0, %v1578_v37, 0.0  ;;  %v1584_v33 = vmul.f32 %v3803_v13, %v3803_v13 }
 0x22b   : > { %v1657_v1 = vadd.f32 %v1656_v59, %v1655_v39 }
 0x22c   : > { %1613 = vadd.xlane.f32.xlu1 %v1612_v38  ;;  %v1652_v28 = vadd.f32 %v1651_v51, %v1650_v43  ;;  %v1660_v46 = vadd.f32 %v1583_v57, %v1582_v61  ;;  %v1661_v18 = vsel %vm834_vm0, %v1584_v33, 0.0  ;;  %v1761_v38 = vld [vmem:[%s4068_s3] sm:$0x7]  ;;  %v4229_v51 = vld [vmem:[#allocation23_spill] sm:$0xff] }
 0x22d   : > { %v1826_v61 = vld [vmem:[%s4069_s4] sm:$0x7]  ;;  %v3846_v33 = vrot.slane %v1761_v38, %v4229_v51 }
 0x22e   : > { %1658 = vadd.xlane.f32.xlu0 %v1657_v1  ;;  %v1662_v62 = vadd.f32 %v1661_v18, %v1660_v46  ;;  %v4231_v18 = vld [vmem:[#allocation26_spill] sm:$0xff] }
 0x230   : > { %1653 = vadd.xlane.f32.xlu1 %v1652_v28  ;;  %v4230_v28 = vld [vmem:[#allocation24_spill] sm:$0xff] }
 0x231   : > { %v3849_v46 = vrot.slane %v1761_v38, %v4230_v28 }
 0x234   : > { %1663 = vadd.xlane.f32.xlu1 %v1662_v62  ;;  %v3852_v62 = vrot.slane %v1761_v38, %v4231_v18 }
 0x292   : > { %v1589_v6 = vpop.xlane.xlu0 %1588 }
 0x293   : > { %v1665_v3 = vmul.f32 0.003125, %v1589_v6 }
 0x295   : > { %v1681_v47 = vadd.f32 1e-05, %v1665_v3 }
 0x297   : > { %2571 = vrsqrt.f32 %v1681_v47 }
 0x298   : > { %v1619_v2 = vpop.xlane.xlu0 %1618 }
 0x299   : > { %v1671_v39 = vmul.f32 0.003125, %v1619_v2  ;;  %v3855_v2 = vrot.slane %v1826_v61, %v4229_v51 }
 0x29b   : > { %v1687_v26 = vadd.f32 1e-05, %v1671_v39  ;;  %v3858_v39 = vrot.slane %v1826_v61, %v4230_v28 }
 0x29c   : > { %v1599_v37 = vpop.xlane.xlu0 %1598 }
 0x29d   : > { %2573 = vrsqrt.f32 %v1687_v26  ;;  %v1667_v59 = vmul.f32 0.003125, %v1599_v37  ;;  %v3861_v26 = vrot.slane %v1826_v61, %v4231_v18 }
 0x29f   : > { %v1683_v43 = vadd.f32 1e-05, %v1667_v59 }
 0x2a1   : > { %2575 = vrsqrt.f32 %v1683_v43  ;;  %v2572_v47 = vpop.eup %2571 }
 0x2a2   : > { %v1594_v1 = vpop.xlane.xlu1 %1593  ;;  %v1714_v43 = vmul.f32 %v2572_v47, %v3587_v21  ;;  %v1715_v38 = vmul.f32 %v2572_v47, %v3590_v29 }
 0x2a3   : > { %v1666_v57 = vmul.f32 0.003125, %v1594_v1  ;;  %v1713_v1 = vmul.f32 %v2572_v47, %v3584_v12 }
 0x2a4   : > { %v1639_v3 = vpop.xlane.xlu0 %1638  ;;  %v1779_v28 = vmul.f32 %v3849_v46, %v1714_v43  ;;  %v1780_v41 = vmul.f32 %v3852_v62, %v1715_v38 }
 0x2a5   : > { %v1682_v6 = vadd.f32 1e-05, %v1666_v57  ;;  %v1675_v59 = vmul.f32 0.003125, %v1639_v3  ;;  %v1778_v51 = vmul.f32 %v3846_v33, %v1713_v1 }
 0x2a6   : > { %v1624_v37 = vpop.xlane.xlu1 %1623  ;;  %v1844_v21 = vadd.f32 %v3858_v39, %v1779_v28  ;;  %v1845_v29 = vadd.f32 %v3861_v26, %v1780_v41 }
 0x2a7   : > { %2577 = vrsqrt.f32 %v1682_v6  ;;  %v1672_v57 = vmul.f32 0.003125, %v1624_v37  ;;  %v1691_v13 = vadd.f32 1e-05, %v1675_v59  ;;  %v2574_v61 = vpop.eup %2573  ;;  %v1843_v12 = vadd.f32 %v3855_v2, %v1778_v51 }
 0x2a8   : > { %v1731_v6 = vmul.f32 %v2574_v61, %v3608_v30  ;;  %v1733_v37 = vmul.f32 %v2574_v61, %v3614_v48  ;;  %v2286_v43 = vpack.c.bf16 %v1845_v29, %v1845_v29 }
 0x2a9   : > { %v1688_v18 = vadd.f32 1e-05, %v1672_v57  ;;  %2579 = vrsqrt.f32 %v1691_v13  ;;  %v1732_v13 = vmul.f32 %v2574_v61, %v3611_v44  ;;  %v2285_v1 = vpack.c.bf16 %v1844_v21, %v1843_v12 }
 0x2aa   : > { %v1604_v3 = vpop.xlane.xlu1 %1603  ;;  %v1796_v41 = vmul.f32 %v3846_v33, %v1731_v6  ;;  %v1798_v51 = vmul.f32 %v3852_v62, %v1733_v37  ;;  %2053 = vst.msk [vmem:[%s3878_s23 + $0x8] sm:$0xf] %vm2052_vm1, %v2286_v43 }
 0x2ab   : > { %2581 = vrsqrt.f32 %v1688_v18  ;;  %v1668_v59 = vmul.f32 0.003125, %v1604_v3  ;;  %v2576_v38 = vpop.eup %2575  ;;  %v1797_v57 = vmul.f32 %v3849_v46, %v1732_v13  ;;  %2051 = vst [vmem:[%s3878_s23] sm:$0xff] %v2285_v1 }
 0x2ac   : > { %v1861_v44 = vadd.f32 %v3855_v2, %v1796_v41  ;;  %v1719_v48 = vmul.f32 %v2576_v38, %v3631_v22  ;;  %v1720_v61 = vmul.f32 %v2576_v38, %v3634_v52  ;;  %v1721_v18 = vmul.f32 %v2576_v38, %v3637_v42 }
 0x2ad   : > { %v1629_v47 = vpop.xlane.xlu0 %1628  ;;  %v1684_v28 = vadd.f32 1e-05, %v1668_v59  ;;  %v1862_v12 = vadd.f32 %v3858_v39, %v1797_v57  ;;  %v1863_v21 = vadd.f32 %v3861_v26, %v1798_v51 }
 0x2ae   : > { %v1673_v30 = vmul.f32 0.003125, %v1629_v47  ;;  %v1784_v47 = vmul.f32 %v3846_v33, %v1719_v48  ;;  %v1785_v13 = vmul.f32 %v3849_v46, %v1720_v61  ;;  %v1786_v22 = vmul.f32 %v3852_v62, %v1721_v18 }
 0x2af   : > { %2583 = vrsqrt.f32 %v1684_v28  ;;  %v2297_v52 = vpack.c.bf16 %v1862_v12, %v1861_v44  ;;  %v2298_v59 = vpack.c.bf16 %v1863_v21, %v1863_v21 }
 0x2b0   : > { %v1689_v29 = vadd.f32 1e-05, %v1673_v30  ;;  %v1849_v41 = vadd.f32 %v3855_v2, %v1784_v47  ;;  %v1850_v30 = vadd.f32 %v3858_v39, %v1785_v13  ;;  %v1851_v38 = vadd.f32 %v3861_v26, %v1786_v22  ;;  %v4232_v22 = vld [vmem:[#allocation16_spill] sm:$0xff] }
 0x2b1   : > { %v1644_v3 = vpop.xlane.xlu1 %1643  ;;  %v2578_v6 = vpop.eup %2577  ;;  %2064 = vst [vmem:[%s3878_s23 + $0x48] sm:$0xff] %v2297_v52  ;;  %2065 = vst.msk [vmem:[%s3878_s23 + $0x50] sm:$0xf] %vm2052_vm1, %v2298_v59 }
 0x2b2   : > { %v1676_v37 = vmul.f32 0.003125, %v1644_v3  ;;  %v1716_v42 = vmul.f32 %v2578_v6, %v3640_v4  ;;  %v1717_v1 = vmul.f32 %v2578_v6, %v3643_v54  ;;  %v1718_v43 = vmul.f32 %v2578_v6, %v3646_v53  ;;  %v1609_v18 = vpop.xlane.xlu0 %1608 }
 0x2b3   : > { %v2580_v51 = vpop.eup %2579  ;;  %2585 = vrsqrt.f32 %v1689_v29  ;;  %v2289_v44 = vpack.c.bf16 %v1850_v30, %v1849_v41  ;;  %v2290_v48 = vpack.c.bf16 %v1851_v38, %v1851_v38 }
 0x2b4   : > { %v1781_v28 = vmul.f32 %v3846_v33, %v1716_v42  ;;  %v1782_v4 = vmul.f32 %v3849_v46, %v1717_v1  ;;  %v1692_v54 = vadd.f32 1e-05, %v1676_v37  ;;  %v1783_v53 = vmul.f32 %v3852_v62, %v1718_v43  ;;  %v4233_v37 = vld [vmem:[#allocation14_spill] sm:$0xff] }
 0x2b5   : > { %v1634_v57 = vpop.xlane.xlu1 %1633  ;;  %v1743_v61 = vmul.f32 %v2580_v51, %v3669_v35  ;;  %v2582_v3 = vpop.eup %2581  ;;  %v1744_v6 = vmul.f32 %v2580_v51, %v3672_v16  ;;  %v1745_v47 = vmul.f32 %v2580_v51, %v3675_v15  ;;  %2056 = vst [vmem:[%s3878_s23 + $0x18] sm:$0xff] %v2289_v44  ;;  %2057 = vst.msk [vmem:[%s3878_s23 + $0x20] sm:$0xf] %vm2052_vm1, %v2290_v48 }
 0x2b6   : > { %v1846_v12 = vadd.f32 %v3855_v2, %v1781_v28  ;;  %v1847_v21 = vadd.f32 %v3858_v39, %v1782_v4  ;;  %v1848_v13 = vadd.f32 %v3861_v26, %v1783_v53  ;;  %v1734_v29 = vmul.f32 %v2582_v3, %v3593_v58 }
 0x2b7   : > { %v1735_v35 = vmul.f32 %v2582_v3, %v4232_v22  ;;  %v1736_v52 = vmul.f32 %v2582_v3, %v4233_v37  ;;  %v1808_v42 = vmul.f32 %v3846_v33, %v1743_v61  ;;  %v1809_v16 = vmul.f32 %v3849_v46, %v1744_v6  ;;  %v1649_v3 = vpop.xlane.xlu0 %1648 }
 0x2b8   : > { %v2287_v59 = vpack.c.bf16 %v1847_v21, %v1846_v12  ;;  %v1810_v15 = vmul.f32 %v3852_v62, %v1745_v47  ;;  %v2288_v43 = vpack.c.bf16 %v1848_v13, %v1848_v13  ;;  %v1799_v41 = vmul.f32 %v3846_v33, %v1734_v29 }
 0x2b9   : > { %v1614_v1 = vpop.xlane.xlu1 %1613  ;;  %v1800_v30 = vmul.f32 %v3849_v46, %v1735_v35  ;;  %v1801_v58 = vmul.f32 %v3852_v62, %v1736_v52  ;;  %v2584_v38 = vpop.eup %2583  ;;  %v1873_v51 = vadd.f32 %v3855_v2, %v1808_v42  ;;  %v1874_v28 = vadd.f32 %v3858_v39, %v1809_v16 }
 0x2ba   : > { %2054 = vst [vmem:[%s3878_s23 + $0xc] sm:$0xff] %v2287_v59  ;;  %v1875_v4 = vadd.f32 %v3861_v26, %v1810_v15  ;;  %2587 = vrsqrt.f32 %v1692_v54  ;;  %2055 = vst.msk [vmem:[%s3878_s23 + $0x14] sm:$0xf] %vm2052_vm1, %v2288_v43  ;;  %v1864_v53 = vadd.f32 %v3855_v2, %v1799_v41  ;;  %v1722_v61 = vmul.f32 %v2584_v38, %v3660_v60  ;;  %v4234_v54 = vld [vmem:[#allocation17_spill] sm:$0xff] }
 0x2bb   : > { %v1865_v44 = vadd.f32 %v3858_v39, %v1800_v30  ;;  %v1866_v48 = vadd.f32 %v3861_v26, %v1801_v58  ;;  %v2305_v12 = vpack.c.bf16 %v1874_v28, %v1873_v51  ;;  %v1723_v6 = vmul.f32 %v2584_v38, %v3663_v32 }
 0x2bc   : > { %v2306_v21 = vpack.c.bf16 %v1875_v4, %v1875_v4  ;;  %v1724_v47 = vmul.f32 %v2584_v38, %v4234_v54  ;;  %v1787_v22 = vmul.f32 %v3846_v33, %v1722_v61  ;;  %v1669_v35 = vmul.f32 0.003125, %v1609_v18 }
 0x2bd   : > { %v2299_v13 = vpack.c.bf16 %v1865_v44, %v1864_v53  ;;  %v2300_v29 = vpack.c.bf16 %v1866_v48, %v1866_v48  ;;  %v2586_v37 = vpop.eup %2585  ;;  %2072 = vst [vmem:[%s3878_s23 + $0x78] sm:$0xff] %v2305_v12  ;;  %v1788_v60 = vmul.f32 %v3849_v46, %v1723_v6  ;;  %v1674_v59 = vmul.f32 0.003125, %v1634_v57  ;;  %v1654_v16 = vpop.xlane.xlu1 %1653 }
 0x2be   : > { %2073 = vst.msk [vmem:[%s3878_s23 + $0x80] sm:$0xf] %vm2052_vm1, %v2306_v21  ;;  %v1789_v52 = vmul.f32 %v3852_v62, %v1724_v47  ;;  %v1677_v42 = vmul.f32 0.003125, %v1649_v3  ;;  %v1852_v32 = vadd.f32 %v3855_v2, %v1787_v22  ;;  %v1737_v15 = vmul.f32 %v2586_v37, %v3694_v7  ;;  %v1659_v7 = vpop.xlane.xlu0 %1658 }
 0x2bf   : > { %2066 = vst [vmem:[%s3878_s23 + $0x54] sm:$0xff] %v2299_v13  ;;  %2067 = vst.msk [vmem:[%s3878_s23 + $0x5c] sm:$0xf] %vm2052_vm1, %v2300_v29  ;;  %v1738_v18 = vmul.f32 %v2586_v37, %v3697_v56  ;;  %v1739_v43 = vmul.f32 %v2586_v37, %v3700_v34  ;;  %v1853_v41 = vadd.f32 %v3858_v39, %v1788_v60  ;;  %v1685_v58 = vadd.f32 1e-05, %v1669_v35 }
 0x2c0   : > { %v1854_v30 = vadd.f32 %v3861_v26, %v1789_v52  ;;  %v1690_v57 = vadd.f32 1e-05, %v1674_v59  ;;  %v1802_v38 = vmul.f32 %v3846_v33, %v1737_v15  ;;  %v1693_v4 = vadd.f32 1e-05, %v1677_v42 }
 0x2c1   : > { %v1803_v51 = vmul.f32 %v3849_v46, %v1738_v18  ;;  %v1804_v28 = vmul.f32 %v3852_v62, %v1739_v43  ;;  %v2291_v53 = vpack.c.bf16 %v1853_v41, %v1852_v32  ;;  %2589 = vrsqrt.f32 %v1685_v58  ;;  %v1664_v54 = vpop.xlane.xlu1 %1663 }
 0x2c2   : > { %v2292_v56 = vpack.c.bf16 %v1854_v30, %v1854_v30  ;;  %v1670_v34 = vmul.f32 0.003125, %v1614_v1  ;;  %v1867_v44 = vadd.f32 %v3855_v2, %v1802_v38  ;;  %2591 = vrsqrt.f32 %v1690_v57 }
 0x2c3   : > { %v1868_v48 = vadd.f32 %v3858_v39, %v1803_v51  ;;  %v1869_v61 = vadd.f32 %v3861_v26, %v1804_v28  ;;  %2058 = vst [vmem:[%s3878_s23 + $0x24] sm:$0xff] %v2291_v53  ;;  %2593 = vrsqrt.f32 %v1693_v4  ;;  %v1679_v21 = vmul.f32 0.003125, %v1659_v7 }
 0x2c4   : > { %v2588_v3 = vpop.eup %2587  ;;  %2059 = vst.msk [vmem:[%s3878_s23 + $0x2c] sm:$0xf] %vm2052_vm1, %v2292_v56  ;;  %v1686_v12 = vadd.f32 1e-05, %v1670_v34  ;;  %v1678_v6 = vmul.f32 0.003125, %v1654_v16 }
 0x2c5   : > { %v2301_v47 = vpack.c.bf16 %v1868_v48, %v1867_v44  ;;  %v2302_v1 = vpack.c.bf16 %v1869_v61, %v1869_v61  ;;  %v1746_v13 = vmul.f32 %v2588_v3, %v3685_v50  ;;  %v1747_v29 = vmul.f32 %v2588_v3, %v3688_v19 }
 0x2c6   : > { %v1748_v22 = vmul.f32 %v2588_v3, %v3691_v63  ;;  %v1695_v35 = vadd.f32 1e-05, %v1679_v21  ;;  %2595 = vrsqrt.f32 %v1686_v12  ;;  %v1680_v52 = vmul.f32 0.003125, %v1664_v54 }
 0x2c7   : > { %2068 = vst [vmem:[%s3878_s23 + $0x60] sm:$0xff] %v2301_v47  ;;  %2069 = vst.msk [vmem:[%s3878_s23 + $0x68] sm:$0xf] %vm2052_vm1, %v2302_v1  ;;  %v1811_v37 = vmul.f32 %v3846_v33, %v1746_v13  ;;  %v1812_v60 = vmul.f32 %v3849_v46, %v1747_v29  ;;  %v1694_v42 = vadd.f32 1e-05, %v1678_v6 }
 0x2c8   : > { %v1813_v59 = vmul.f32 %v3852_v62, %v1748_v22  ;;  %2597 = vrsqrt.f32 %v1695_v35  ;;  %v1696_v16 = vadd.f32 1e-05, %v1680_v52 }
 0x2c9   : > { %v1876_v50 = vadd.f32 %v3855_v2, %v1811_v37  ;;  %v1877_v19 = vadd.f32 %v3858_v39, %v1812_v60  ;;  %2599 = vrsqrt.f32 %v1694_v42 }
 0x2ca   : > { %v1878_v63 = vadd.f32 %v3861_v26, %v1813_v59  ;;  %2601 = vrsqrt.f32 %v1696_v16 }
 0x2cb   : > { %v2307_v32 = vpack.c.bf16 %v1877_v19, %v1876_v50  ;;  %v2590_v15 = vpop.eup %2589 }
 0x2cc   : > { %v2308_v18 = vpack.c.bf16 %v1878_v63, %v1878_v63  ;;  %v2592_v43 = vpop.eup %2591  ;;  %v1725_v41 = vmul.f32 %v2590_v15, %v3722_v49  ;;  %v1726_v30 = vmul.f32 %v2590_v15, %v3725_v23  ;;  %v1727_v58 = vmul.f32 %v2590_v15, %v3728_v20 }
 0x2cd   : > { %2074 = vst [vmem:[%s3878_s23 + $0x84] sm:$0xff] %v2307_v32  ;;  %v2594_v57 = vpop.eup %2593  ;;  %v1740_v38 = vmul.f32 %v2592_v43, %v3713_v10  ;;  %v1741_v51 = vmul.f32 %v2592_v43, %v3716_v0  ;;  %v1742_v28 = vmul.f32 %v2592_v43, %v3719_v31 }
 0x2ce   : > { %2075 = vst.msk [vmem:[%s3878_s23 + $0x8c] sm:$0xf] %vm2052_vm1, %v2308_v18  ;;  %v1790_v4 = vmul.f32 %v3846_v33, %v1725_v41  ;;  %v1791_v7 = vmul.f32 %v3849_v46, %v1726_v30  ;;  %v1792_v49 = vmul.f32 %v3852_v62, %v1727_v58  ;;  %v1749_v23 = vmul.f32 %v2594_v57, %v3749_v36 }
 0x2cf   : > { %v1805_v20 = vmul.f32 %v3846_v33, %v1740_v38  ;;  %v1806_v53 = vmul.f32 %v3849_v46, %v1741_v51  ;;  %v1807_v56 = vmul.f32 %v3852_v62, %v1742_v28  ;;  %v1750_v10 = vmul.f32 %v2594_v57, %v3752_v11 }
 0x2d0   : > { %v2596_v0 = vpop.eup %2595  ;;  %v1855_v31 = vadd.f32 %v3855_v2, %v1790_v4  ;;  %v1856_v34 = vadd.f32 %v3858_v39, %v1791_v7  ;;  %v1857_v44 = vadd.f32 %v3861_v26, %v1792_v49  ;;  %v1751_v48 = vmul.f32 %v2594_v57, %v3755_v40 }
 0x2d1   : > { %v1870_v36 = vadd.f32 %v3855_v2, %v1805_v20  ;;  %v1871_v61 = vadd.f32 %v3858_v39, %v1806_v53  ;;  %v1872_v3 = vadd.f32 %v3861_v26, %v1807_v56  ;;  %v1814_v12 = vmul.f32 %v3846_v33, %v1749_v23  ;;  %v4235_v53 = vld [vmem:[#allocation15_spill] sm:$0xff] }
 0x2d2   : > { %v2598_v11 = vpop.eup %2597  ;;  %v2293_v21 = vpack.c.bf16 %v1856_v34, %v1855_v31  ;;  %v2294_v6 = vpack.c.bf16 %v1857_v44, %v1857_v44  ;;  %v1815_v54 = vmul.f32 %v3849_v46, %v1750_v10  ;;  %v1816_v47 = vmul.f32 %v3852_v62, %v1751_v48  ;;  %v4236_v10 = vld [vmem:[#allocation20_spill] sm:$0xff] }
 0x2d3   : > { %v2303_v1 = vpack.c.bf16 %v1871_v61, %v1870_v36  ;;  %v2304_v13 = vpack.c.bf16 %v1872_v3, %v1872_v3  ;;  %v1879_v40 = vadd.f32 %v3855_v2, %v1814_v12  ;;  %v1728_v29 = vmul.f32 %v2596_v0, %v3740_v5  ;;  %v2600_v52 = vpop.eup %2599 }
 0x2d4   : > { %2060 = vst [vmem:[%s3878_s23 + $0x30] sm:$0xff] %v2293_v21  ;;  %2061 = vst.msk [vmem:[%s3878_s23 + $0x38] sm:$0xf] %vm2052_vm1, %v2294_v6  ;;  %v1880_v22 = vadd.f32 %v3858_v39, %v1815_v54  ;;  %v1881_v35 = vadd.f32 %v3861_v26, %v1816_v47  ;;  %v1729_v37 = vmul.f32 %v2596_v0, %v3743_v8  ;;  %v2602_v16 = vpop.eup %2601 }
 0x2d5   : > { %v1730_v60 = vmul.f32 %v2596_v0, %v3746_v9  ;;  %2070 = vst [vmem:[%s3878_s23 + $0x6c] sm:$0xff] %v2303_v1  ;;  %2071 = vst.msk [vmem:[%s3878_s23 + $0x74] sm:$0xf] %vm2052_vm1, %v2304_v13  ;;  %v1793_v59 = vmul.f32 %v3846_v33, %v1728_v29  ;;  %v1755_v5 = vmul.f32 %v2598_v11, %v3778_v25 }
 0x2d6   : > { %v1756_v42 = vmul.f32 %v2598_v11, %v3781_v45  ;;  %v1757_v50 = vmul.f32 %v2598_v11, %v3784_v55  ;;  %v2309_v19 = vpack.c.bf16 %v1880_v22, %v1879_v40  ;;  %v2310_v63 = vpack.c.bf16 %v1881_v35, %v1881_v35 }
 0x2d7   : > { %v1794_v8 = vmul.f32 %v3849_v46, %v1729_v37  ;;  %v1795_v9 = vmul.f32 %v3852_v62, %v1730_v60  ;;  %v1858_v32 = vadd.f32 %v3855_v2, %v1793_v59  ;;  %v1820_v15 = vmul.f32 %v3846_v33, %v1755_v5 }
 0x2d8   : > { %v1821_v18 = vmul.f32 %v3849_v46, %v1756_v42  ;;  %v1822_v43 = vmul.f32 %v3852_v62, %v1757_v50  ;;  %2076 = vst [vmem:[%s3878_s23 + $0x90] sm:$0xff] %v2309_v19  ;;  %2077 = vst.msk [vmem:[%s3878_s23 + $0x98] sm:$0xf] %vm2052_vm1, %v2310_v63  ;;  %v1752_v55 = vmul.f32 %v2600_v52, %v3769_v24 }
 0x2d9   : > { %v1859_v25 = vadd.f32 %v3858_v39, %v1794_v8  ;;  %v1860_v45 = vadd.f32 %v3861_v26, %v1795_v9  ;;  %v1753_v41 = vmul.f32 %v2600_v52, %v3772_v17  ;;  %v1885_v30 = vadd.f32 %v3855_v2, %v1820_v15 }
 0x2da   : > { %v1886_v58 = vadd.f32 %v3858_v39, %v1821_v18  ;;  %v1887_v57 = vadd.f32 %v3861_v26, %v1822_v43  ;;  %v1754_v38 = vmul.f32 %v2600_v52, %v3775_v14  ;;  %v1817_v4 = vmul.f32 %v3846_v33, %v1752_v55 }
 0x2db   : > { %v2295_v51 = vpack.c.bf16 %v1859_v25, %v1858_v32  ;;  %v2296_v28 = vpack.c.bf16 %v1860_v45, %v1860_v45  ;;  %v1818_v7 = vmul.f32 %v3849_v46, %v1753_v41  ;;  %v1758_v23 = vmul.f32 %v2602_v16, %v3797_v27 }
 0x2dc   : > { %v2313_v49 = vpack.c.bf16 %v1886_v58, %v1885_v30  ;;  %v2314_v24 = vpack.c.bf16 %v1887_v57, %v1887_v57  ;;  %v1819_v17 = vmul.f32 %v3852_v62, %v1754_v38  ;;  %v1882_v20 = vadd.f32 %v3855_v2, %v1817_v4 }
 0x2dd   : > { %2062 = vst [vmem:[%s3878_s23 + $0x3c] sm:$0xff] %v2295_v51  ;;  %2063 = vst.msk [vmem:[%s3878_s23 + $0x44] sm:$0xf] %vm2052_vm1, %v2296_v28  ;;  %v1883_v14 = vadd.f32 %v3858_v39, %v1818_v7  ;;  %v1759_v56 = vmul.f32 %v2602_v16, %v4235_v53  ;;  %v1760_v0 = vmul.f32 %v2602_v16, %v4236_v10 }
 0x2de   : > { %2080 = vst [vmem:[%s3878_s23 + $0xa8] sm:$0xff] %v2313_v49  ;;  %2081 = vst.msk [vmem:[%s3878_s23 + $0xb0] sm:$0xf] %vm2052_vm1, %v2314_v24  ;;  %v1884_v27 = vadd.f32 %v3861_v26, %v1819_v17  ;;  %v1823_v31 = vmul.f32 %v3846_v33, %v1758_v23 }
 0x2df   : > { %v2311_v34 = vpack.c.bf16 %v1883_v14, %v1882_v20  ;;  %v1824_v44 = vmul.f32 %v3849_v46, %v1759_v56  ;;  %v1825_v48 = vmul.f32 %v3852_v62, %v1760_v0 }
 0x2e0   : > { %v2312_v36 = vpack.c.bf16 %v1884_v27, %v1884_v27  ;;  %v1888_v61 = vadd.f32 %v3855_v2, %v1823_v31 }
 0x2e1   : > { %2078 = vst [vmem:[%s3878_s23 + $0x9c] sm:$0xff] %v2311_v34  ;;  %v1889_v3 = vadd.f32 %v3858_v39, %v1824_v44  ;;  %v1890_v12 = vadd.f32 %v3861_v26, %v1825_v48 }
 0x2e2   : > { %2079 = vst.msk [vmem:[%s3878_s23 + $0xa4] sm:$0xf] %vm2052_vm1, %v2312_v36 }
 0x2e3   : > { %v2315_v11 = vpack.c.bf16 %v1889_v3, %v1888_v61  ;;  %v2316_v21 = vpack.c.bf16 %v1890_v12, %v1890_v12 }
 0x2e5   : > { %2082 = vst [vmem:[%s3878_s23 + $0xb4] sm:$0xff] %v2315_v11  ;;  %2083 = vst.msk [vmem:[%s3878_s23 + $0xbc] sm:$0xf] %vm2052_vm1, %v2316_v21 }
 0x2e6 PF: > { %s15_s18 = sadd.s32 1, %s2609_s18  }
 0x2e7   : > { %p12_p4 = scmp.ge.s32.totalorder %s15_s18, 6  }
 0x2e9   :  { %14 = sbr.rel (!%p12_p4) target bundleno = 1 (0x1), region = 70 }

</bundles_post_ra>
